<compile_context>
chip_gen: v6e
topology: v6e:2x2x1
jax: 0.10.0
libtpu: 0.0.40
codegen_flags: <defaults>
</compile_context>

<pallas_src>
import math

import jax
import jax.numpy as jnp
from jax.experimental import pallas as pl
from jax.experimental.pallas import tpu as pltpu

# ----------------------------- config (small BERT) -------------------------
B, S = 2, 8              # batch, sequence length
H = 32                   # hidden size          (768 in bert-base)
NH = 4                   # attention heads      (12 in bert-base)
DH = H // NH             # head dim
INTER = 64               # intermediate size    (3072 in bert-base)
LAYERS = 2               # encoder layers       (12 in bert-base)
VOCAB = 50
TYPE_VOCAB = 2
MAX_POS = 32
NUM_CLASSES = 3          # nn.Linear(768, 3) head
LN_EPS = 1e-12


# ----------------------------- fused kernel ---------------------------------
def fused_bert_kernel(
    emb_ref, bias_ref, eg_ref, eb_ref,                   # embeddings + emb LayerNorm
    wqkv_ref, bqkv_ref, wo_ref, bo_ref, g1_ref, b1_ref,  # attention block (stacked per layer)
    wi_ref, bi_ref, wf_ref, bf_ref, g2_ref, b2_ref,      # FFN block       (stacked per layer)
    pw_ref, pb_ref, ow_ref, ob_ref,                      # pooler + classifier head
    out_ref,                                             # [B, NUM_CLASSES] logits
    ctx_ref,                                             # VMEM scratch [B*S, H]
):
    inv_sqrt_dh = jnp.float32(1.0 / math.sqrt(DH))
    inv_sqrt_2 = jnp.float32(1.0 / math.sqrt(2.0))

    def layernorm(x, g, b):
        mu = jnp.mean(x, axis=-1, keepdims=True)
        var = jnp.mean(jnp.square(x - mu), axis=-1, keepdims=True)
        return (x - mu) * jax.lax.rsqrt(var + jnp.float32(LN_EPS)) * g + b

    def gelu(x):                                         # exact (erf) GELU, as in BERT
        return 0.5 * x * (1.0 + jax.lax.erf(x * inv_sqrt_2))

    # --- embedding LayerNorm ---
    x = layernorm(emb_ref[...], eg_ref[...], eb_ref[...])          # [B*S, H]

    # Additive attention-mask bias, materialized ONCE and reused every layer/head.
    mask_bias = jnp.broadcast_to(bias_ref[...], (B, S, S))          # [B, S, S]

    # --- encoder: all intermediates stay in VMEM / vregs ---
    for l in range(LAYERS):
        # fused QKV projection: single MXU pass, N = 3H
        qkv = jnp.dot(x, wqkv_ref[l], preferred_element_type=jnp.float32) + bqkv_ref[l]

        # per-head attention, batched over the batch dimension
        for h in range(NH):
            q = qkv[:, h * DH:(h + 1) * DH].reshape(B, S, DH)
            k = qkv[:, H + h * DH:H + (h + 1) * DH].reshape(B, S, DH)
            v = qkv[:, 2 * H + h * DH:2 * H + (h + 1) * DH].reshape(B, S, DH)

            s = jax.lax.dot_general(                     # [B, S, S] = q @ k^T (batched)
                q, k, (((2,), (2,)), ((0,), (0,))),
                preferred_element_type=jnp.float32)
            s = s * inv_sqrt_dh + mask_bias
            s = s - jnp.max(s, axis=-1, keepdims=True)
            p = jnp.exp(s)
            p = p / jnp.sum(p, axis=-1, keepdims=True)

            c = jax.lax.dot_general(                     # [B, S, DH] = p @ v (batched)
                p, v, (((2,), (1,)), ((0,), (0,))),
                preferred_element_type=jnp.float32)
            ctx_ref[:, h * DH:(h + 1) * DH] = c.reshape(B * S, DH)

        # attention output projection + residual + LayerNorm
        attn = jnp.dot(ctx_ref[...], wo_ref[l],
                       preferred_element_type=jnp.float32) + bo_ref[l]
        x = layernorm(attn + x, g1_ref[l], b1_ref[l])

        # FFN (GELU) + residual + LayerNorm
        inter = gelu(jnp.dot(x, wi_ref[l], preferred_element_type=jnp.float32) + bi_ref[l])
        ffn = jnp.dot(inter, wf_ref[l], preferred_element_type=jnp.float32) + bf_ref[l]
        x = layernorm(ffn + x, g2_ref[l], b2_ref[l])

    # --- pooler on CLS tokens + classification head, batched over B ---
    cls = jnp.concatenate([x[b * S:b * S + 1, :] for b in range(B)], axis=0)   # [B, H]
    pooled = jnp.tanh(
        jnp.dot(cls, pw_ref[...], preferred_element_type=jnp.float32) + pb_ref[...])
    logits = jnp.dot(pooled, ow_ref[...],
                     preferred_element_type=jnp.float32) + ob_ref[...]
    out_ref[...] = logits.astype(out_ref.dtype)


# ----------------------------- parameters -----------------------------------
def init_params(key):
    keys = iter(jax.random.split(key, 32))

    def nrm(shape):
        return 0.02 * jax.random.normal(next(keys), shape, jnp.float32)

    return dict(
        word_emb=nrm((VOCAB, H)),
        pos_emb=nrm((MAX_POS, H)),
        type_emb=nrm((TYPE_VOCAB, H)),
        emb_ln_g=jnp.ones((1, H), jnp.float32),
        emb_ln_b=jnp.zeros((1, H), jnp.float32),
        # per-layer weights stacked on a leading LAYERS axis
        wqkv=nrm((LAYERS, H, 3 * H)),
        bqkv=jnp.zeros((LAYERS, 1, 3 * H), jnp.float32),
        wo=nrm((LAYERS, H, H)),
        bo=jnp.zeros((LAYERS, 1, H), jnp.float32),
        ln1_g=jnp.ones((LAYERS, 1, H), jnp.float32),
        ln1_b=jnp.zeros((LAYERS, 1, H), jnp.float32),
        wi=nrm((LAYERS, H, INTER)),
        bi=jnp.zeros((LAYERS, 1, INTER), jnp.float32),
        wf=nrm((LAYERS, INTER, H)),
        bf=jnp.zeros((LAYERS, 1, H), jnp.float32),
        ln2_g=jnp.ones((LAYERS, 1, H), jnp.float32),
        ln2_b=jnp.zeros((LAYERS, 1, H), jnp.float32),
        pooler_w=nrm((H, H)),
        pooler_b=jnp.zeros((1, H), jnp.float32),
        out_w=nrm((H, NUM_CLASSES)),
        out_b=jnp.zeros((1, NUM_CLASSES), jnp.float32),
    )


# ----------------------------- model forward --------------------------------
@jax.jit
def bert_classification_forward(params, ids, mask, token_type_ids):
    # --- embedding gathers (host-JAX glue; LayerNorm runs inside the kernel) ---
    pos = jnp.arange(S)
    emb = (
        params["word_emb"][ids]
        + params["pos_emb"][pos][None, :, :]
        + params["type_emb"][token_type_ids]
    ).reshape(B * S, H)

    # --- attention mask -> additive bias, shaped [B, 1, S] for the kernel ---
    bias = ((1.0 - mask.astype(jnp.float32)) * jnp.float32(-1e9))[:, None, :]

    args = (
        emb, bias, params["emb_ln_g"], params["emb_ln_b"],
        params["wqkv"], params["bqkv"], params["wo"], params["bo"],
        params["ln1_g"], params["ln1_b"],
        params["wi"], params["bi"], params["wf"], params["bf"],
        params["ln2_g"], params["ln2_b"],
        params["pooler_w"], params["pooler_b"],
        params["out_w"], params["out_b"],
    )

    vmem = pltpu.MemorySpace.VMEM
    return pl.pallas_call(
        fused_bert_kernel,
        out_shape=jax.ShapeDtypeStruct((B, NUM_CLASSES), jnp.float32),
        in_specs=[pl.BlockSpec(memory_space=vmem) for _ in args],
        out_specs=pl.BlockSpec(memory_space=vmem),
        scratch_shapes=[pltpu.VMEM((B * S, H), jnp.float32)],
    )(*args)


# ----------------------------- main ------------------------------------------
if __name__ == "__main__":
    key = jax.random.PRNGKey(0)
    k_params, k_ids, k_types = jax.random.split(key, 3)

    params = init_params(k_params)

    ids = jax.random.randint(k_ids, (B, S), 0, VOCAB, dtype=jnp.int32)
    token_type_ids = jax.random.randint(k_types, (B, S), 0, TYPE_VOCAB, dtype=jnp.int32)
    mask = jnp.ones((B, S), jnp.int32).at[1, S - 2:].set(0)  # pad last 2 tokens of row 1

    logits = bert_classification_forward(params, ids, mask, token_type_ids)
    jax.block_until_ready(logits)

    assert logits.shape == (B, NUM_CLASSES) and logits.dtype == jnp.float32
    print("KERNEL_OK")
</pallas_src>

<mosaic_0001>
module attributes {stable_mosaic.version = 11 : i64} {
  func.func @fused_bert_kernel(%arg0: memref<16x32xf32, #tpu.memory_space<vmem>>, %arg1: memref<2x1x8xf32, #tpu.memory_space<vmem>>, %arg2: memref<1x32xf32, #tpu.memory_space<vmem>>, %arg3: memref<1x32xf32, #tpu.memory_space<vmem>>, %arg4: memref<2x32x96xf32, #tpu.memory_space<vmem>>, %arg5: memref<2x1x96xf32, #tpu.memory_space<vmem>>, %arg6: memref<2x32x32xf32, #tpu.memory_space<vmem>>, %arg7: memref<2x1x32xf32, #tpu.memory_space<vmem>>, %arg8: memref<2x1x32xf32, #tpu.memory_space<vmem>>, %arg9: memref<2x1x32xf32, #tpu.memory_space<vmem>>, %arg10: memref<2x32x64xf32, #tpu.memory_space<vmem>>, %arg11: memref<2x1x64xf32, #tpu.memory_space<vmem>>, %arg12: memref<2x64x32xf32, #tpu.memory_space<vmem>>, %arg13: memref<2x1x32xf32, #tpu.memory_space<vmem>>, %arg14: memref<2x1x32xf32, #tpu.memory_space<vmem>>, %arg15: memref<2x1x32xf32, #tpu.memory_space<vmem>>, %arg16: memref<32x32xf32, #tpu.memory_space<vmem>>, %arg17: memref<1x32xf32, #tpu.memory_space<vmem>>, %arg18: memref<32x3xf32, #tpu.memory_space<vmem>>, %arg19: memref<1x3xf32, #tpu.memory_space<vmem>>, %arg20: memref<2x3xf32, #tpu.memory_space<vmem>>, %arg21: memref<16x32xf32, #tpu.memory_space<vmem>>) attributes {dimension_semantics = [], scalar_prefetch = 0 : i64, scratch_operands = 1 : i64, tpu.core_type = #tpu.core_type<tc>} {
    %c0 = arith.constant 0 : index
    %c0_0 = arith.constant 0 : index
    %0 = vector.load %arg0[%c0, %c0_0] : memref<16x32xf32, #tpu.memory_space<vmem>>, vector<16x32xf32>
    %c0_1 = arith.constant 0 : index
    %c0_2 = arith.constant 0 : index
    %1 = vector.load %arg2[%c0_1, %c0_2] : memref<1x32xf32, #tpu.memory_space<vmem>>, vector<1x32xf32>
    %c0_3 = arith.constant 0 : index
    %c0_4 = arith.constant 0 : index
    %2 = vector.load %arg3[%c0_3, %c0_4] : memref<1x32xf32, #tpu.memory_space<vmem>>, vector<1x32xf32>
    %cst = arith.constant dense<0.000000e+00> : vector<16xf32>
    %3 = vector.multi_reduction <add>, %0, %cst [1] : vector<16x32xf32> to vector<16xf32>
    %4 = vector.shape_cast %3 : vector<16xf32> to vector<16x1xf32>
    %cst_5 = arith.constant 3.200000e+01 : f32
    %5 = vector.broadcast %cst_5 : f32 to vector<16x1xf32>
    %6 = arith.divf %4, %5 : vector<16x1xf32>
    %7 = vector.broadcast %6 : vector<16x1xf32> to vector<16x32xf32>
    %8 = arith.subf %0, %7 : vector<16x32xf32>
    %9 = arith.mulf %8, %8 : vector<16x32xf32>
    %cst_6 = arith.constant dense<0.000000e+00> : vector<16xf32>
    %10 = vector.multi_reduction <add>, %9, %cst_6 [1] : vector<16x32xf32> to vector<16xf32>
    %11 = vector.shape_cast %10 : vector<16xf32> to vector<16x1xf32>
    %cst_7 = arith.constant 3.200000e+01 : f32
    %12 = vector.broadcast %cst_7 : f32 to vector<16x1xf32>
    %13 = arith.divf %11, %12 : vector<16x1xf32>
    %14 = vector.broadcast %6 : vector<16x1xf32> to vector<16x32xf32>
    %15 = arith.subf %0, %14 : vector<16x32xf32>
    %cst_8 = arith.constant 9.99999996E-13 : f32
    %16 = vector.broadcast %cst_8 : f32 to vector<16x1xf32>
    %17 = arith.addf %13, %16 : vector<16x1xf32>
    %18 = math.rsqrt %17 : vector<16x1xf32>
    %19 = vector.broadcast %18 : vector<16x1xf32> to vector<16x32xf32>
    %20 = arith.mulf %15, %19 : vector<16x32xf32>
    %21 = vector.broadcast %1 : vector<1x32xf32> to vector<16x32xf32>
    %22 = arith.mulf %20, %21 : vector<16x32xf32>
    %23 = vector.broadcast %2 : vector<1x32xf32> to vector<16x32xf32>
    %24 = arith.addf %22, %23 : vector<16x32xf32>
    %c0_9 = arith.constant 0 : index
    %c0_10 = arith.constant 0 : index
    %c0_11 = arith.constant 0 : index
    %25 = vector.load %arg1[%c0_9, %c0_10, %c0_11] : memref<2x1x8xf32, #tpu.memory_space<vmem>>, vector<2x1x8xf32>
    %26 = vector.shape_cast %25 : vector<2x1x8xf32> to vector<2x1x8xf32>
    %27 = vector.broadcast %26 : vector<2x1x8xf32> to vector<2x8x8xf32>
    %c0_12 = arith.constant 0 : index
    %c0_13 = arith.constant 0 : index
    %c0_14 = arith.constant 0 : index
    %28 = vector.load %arg4[%c0_12, %c0_13, %c0_14] : memref<2x32x96xf32, #tpu.memory_space<vmem>>, vector<1x32x96xf32>
    %29 = vector.shape_cast %28 : vector<1x32x96xf32> to vector<32x96xf32>
    %cst_15 = arith.constant dense<0.000000e+00> : vector<16x96xf32>
    %30 = tpu.matmul %24, %29, %cst_15 {dimension_numbers = #tpu.dot_dimension_numbers<[1], [0], [0], [1], [0, 0, 1, 1], [], []>} : vector<16x32xf32>, vector<32x96xf32>, vector<16x96xf32> -> vector<16x96xf32>
    %c0_16 = arith.constant 0 : index
    %c0_17 = arith.constant 0 : index
    %c0_18 = arith.constant 0 : index
    %31 = vector.load %arg5[%c0_16, %c0_17, %c0_18] : memref<2x1x96xf32, #tpu.memory_space<vmem>>, vector<1x1x96xf32>
    %32 = vector.shape_cast %31 : vector<1x1x96xf32> to vector<1x96xf32>
    %33 = vector.broadcast %32 : vector<1x96xf32> to vector<16x96xf32>
    %34 = arith.addf %30, %33 : vector<16x96xf32>
    %35 = vector.extract_strided_slice %34 {offsets = [0, 0], sizes = [16, 8], strides = [1, 1]} : vector<16x96xf32> to vector<16x8xf32>
    %36 = vector.shape_cast %35 : vector<16x8xf32> to vector<2x8x8xf32>
    %37 = vector.extract_strided_slice %34 {offsets = [0, 32], sizes = [16, 8], strides = [1, 1]} : vector<16x96xf32> to vector<16x8xf32>
    %38 = vector.shape_cast %37 : vector<16x8xf32> to vector<2x8x8xf32>
    %39 = vector.extract_strided_slice %34 {offsets = [0, 64], sizes = [16, 8], strides = [1, 1]} : vector<16x96xf32> to vector<16x8xf32>
    %40 = vector.shape_cast %39 : vector<16x8xf32> to vector<2x8x8xf32>
    %cst_19 = arith.constant dense<0.000000e+00> : vector<2x8x8xf32>
    %41 = tpu.matmul %36, %38, %cst_19 {dimension_numbers = #tpu.dot_dimension_numbers<[2], [2], [1], [1], [0, 0, 0, 1, 1, 1], [0], [0]>} : vector<2x8x8xf32>, vector<2x8x8xf32>, vector<2x8x8xf32> -> vector<2x8x8xf32>
    %cst_20 = arith.constant 0.353553385 : f32
    %42 = vector.broadcast %cst_20 : f32 to vector<2x8x8xf32>
    %43 = arith.mulf %41, %42 : vector<2x8x8xf32>
    %44 = arith.addf %43, %27 : vector<2x8x8xf32>
    %cst_21 = arith.constant dense<0xFF800000> : vector<2x8xf32>
    %45 = vector.multi_reduction <maximumf>, %44, %cst_21 [2] : vector<2x8x8xf32> to vector<2x8xf32>
    %46 = vector.shape_cast %45 : vector<2x8xf32> to vector<2x8x1xf32>
    %47 = vector.broadcast %46 : vector<2x8x1xf32> to vector<2x8x8xf32>
    %48 = arith.subf %44, %47 : vector<2x8x8xf32>
    %49 = math.exp %48 : vector<2x8x8xf32>
    %cst_22 = arith.constant dense<0.000000e+00> : vector<2x8xf32>
    %50 = vector.multi_reduction <add>, %49, %cst_22 [2] : vector<2x8x8xf32> to vector<2x8xf32>
    %51 = vector.shape_cast %50 : vector<2x8xf32> to vector<2x8x1xf32>
    %52 = vector.broadcast %51 : vector<2x8x1xf32> to vector<2x8x8xf32>
    %53 = arith.divf %49, %52 : vector<2x8x8xf32>
    %cst_23 = arith.constant dense<0.000000e+00> : vector<2x8x8xf32>
    %54 = tpu.matmul %53, %40, %cst_23 {dimension_numbers = #tpu.dot_dimension_numbers<[2], [1], [1], [2], [0, 0, 0, 1, 1, 2], [0], [0]>} : vector<2x8x8xf32>, vector<2x8x8xf32>, vector<2x8x8xf32> -> vector<2x8x8xf32>
    %55 = vector.shape_cast %54 : vector<2x8x8xf32> to vector<16x8xf32>
    %c0_24 = arith.constant 0 : index
    %c0_25 = arith.constant 0 : index
    %56 = vector.load %arg21[%c0_24, %c0_25] : memref<16x32xf32, #tpu.memory_space<vmem>>, vector<16x8xf32>
    tpu.vector_store %arg21[%c0_24, %c0_25], %55 {strides = array<i32>} : memref<16x32xf32, #tpu.memory_space<vmem>>, vector<16x8xf32>,
    %57 = vector.extract_strided_slice %34 {offsets = [0, 8], sizes = [16, 8], strides = [1, 1]} : vector<16x96xf32> to vector<16x8xf32>
    %58 = vector.shape_cast %57 : vector<16x8xf32> to vector<2x8x8xf32>
    %59 = vector.extract_strided_slice %34 {offsets = [0, 40], sizes = [16, 8], strides = [1, 1]} : vector<16x96xf32> to vector<16x8xf32>
    %60 = vector.shape_cast %59 : vector<16x8xf32> to vector<2x8x8xf32>
    %61 = vector.extract_strided_slice %34 {offsets = [0, 72], sizes = [16, 8], strides = [1, 1]} : vector<16x96xf32> to vector<16x8xf32>
    %62 = vector.shape_cast %61 : vector<16x8xf32> to vector<2x8x8xf32>
    %cst_26 = arith.constant dense<0.000000e+00> : vector<2x8x8xf32>
    %63 = tpu.matmul %58, %60, %cst_26 {dimension_numbers = #tpu.dot_dimension_numbers<[2], [2], [1], [1], [0, 0, 0, 1, 1, 1], [0], [0]>} : vector<2x8x8xf32>, vector<2x8x8xf32>, vector<2x8x8xf32> -> vector<2x8x8xf32>
    %cst_27 = arith.constant 0.353553385 : f32
    %64 = vector.broadcast %cst_27 : f32 to vector<2x8x8xf32>
    %65 = arith.mulf %63, %64 : vector<2x8x8xf32>
    %66 = arith.addf %65, %27 : vector<2x8x8xf32>
    %cst_28 = arith.constant dense<0xFF800000> : vector<2x8xf32>
    %67 = vector.multi_reduction <maximumf>, %66, %cst_28 [2] : vector<2x8x8xf32> to vector<2x8xf32>
    %68 = vector.shape_cast %67 : vector<2x8xf32> to vector<2x8x1xf32>
    %69 = vector.broadcast %68 : vector<2x8x1xf32> to vector<2x8x8xf32>
    %70 = arith.subf %66, %69 : vector<2x8x8xf32>
    %71 = math.exp %70 : vector<2x8x8xf32>
    %cst_29 = arith.constant dense<0.000000e+00> : vector<2x8xf32>
    %72 = vector.multi_reduction <add>, %71, %cst_29 [2] : vector<2x8x8xf32> to vector<2x8xf32>
    %73 = vector.shape_cast %72 : vector<2x8xf32> to vector<2x8x1xf32>
    %74 = vector.broadcast %73 : vector<2x8x1xf32> to vector<2x8x8xf32>
    %75 = arith.divf %71, %74 : vector<2x8x8xf32>
    %cst_30 = arith.constant dense<0.000000e+00> : vector<2x8x8xf32>
    %76 = tpu.matmul %75, %62, %cst_30 {dimension_numbers = #tpu.dot_dimension_numbers<[2], [1], [1], [2], [0, 0, 0, 1, 1, 2], [0], [0]>} : vector<2x8x8xf32>, vector<2x8x8xf32>, vector<2x8x8xf32> -> vector<2x8x8xf32>
    %77 = vector.shape_cast %76 : vector<2x8x8xf32> to vector<16x8xf32>
    %c0_31 = arith.constant 0 : index
    %c8 = arith.constant 8 : index
    %78 = vector.load %arg21[%c0_31, %c8] : memref<16x32xf32, #tpu.memory_space<vmem>>, vector<16x8xf32>
    tpu.vector_store %arg21[%c0_31, %c8], %77 {strides = array<i32>} : memref<16x32xf32, #tpu.memory_space<vmem>>, vector<16x8xf32>,
    %79 = vector.extract_strided_slice %34 {offsets = [0, 16], sizes = [16, 8], strides = [1, 1]} : vector<16x96xf32> to vector<16x8xf32>
    %80 = vector.shape_cast %79 : vector<16x8xf32> to vector<2x8x8xf32>
    %81 = vector.extract_strided_slice %34 {offsets = [0, 48], sizes = [16, 8], strides = [1, 1]} : vector<16x96xf32> to vector<16x8xf32>
    %82 = vector.shape_cast %81 : vector<16x8xf32> to vector<2x8x8xf32>
    %83 = vector.extract_strided_slice %34 {offsets = [0, 80], sizes = [16, 8], strides = [1, 1]} : vector<16x96xf32> to vector<16x8xf32>
    %84 = vector.shape_cast %83 : vector<16x8xf32> to vector<2x8x8xf32>
    %cst_32 = arith.constant dense<0.000000e+00> : vector<2x8x8xf32>
    %85 = tpu.matmul %80, %82, %cst_32 {dimension_numbers = #tpu.dot_dimension_numbers<[2], [2], [1], [1], [0, 0, 0, 1, 1, 1], [0], [0]>} : vector<2x8x8xf32>, vector<2x8x8xf32>, vector<2x8x8xf32> -> vector<2x8x8xf32>
    %cst_33 = arith.constant 0.353553385 : f32
    %86 = vector.broadcast %cst_33 : f32 to vector<2x8x8xf32>
    %87 = arith.mulf %85, %86 : vector<2x8x8xf32>
    %88 = arith.addf %87, %27 : vector<2x8x8xf32>
    %cst_34 = arith.constant dense<0xFF800000> : vector<2x8xf32>
    %89 = vector.multi_reduction <maximumf>, %88, %cst_34 [2] : vector<2x8x8xf32> to vector<2x8xf32>
    %90 = vector.shape_cast %89 : vector<2x8xf32> to vector<2x8x1xf32>
    %91 = vector.broadcast %90 : vector<2x8x1xf32> to vector<2x8x8xf32>
    %92 = arith.subf %88, %91 : vector<2x8x8xf32>
    %93 = math.exp %92 : vector<2x8x8xf32>
    %cst_35 = arith.constant dense<0.000000e+00> : vector<2x8xf32>
    %94 = vector.multi_reduction <add>, %93, %cst_35 [2] : vector<2x8x8xf32> to vector<2x8xf32>
    %95 = vector.shape_cast %94 : vector<2x8xf32> to vector<2x8x1xf32>
    %96 = vector.broadcast %95 : vector<2x8x1xf32> to vector<2x8x8xf32>
    %97 = arith.divf %93, %96 : vector<2x8x8xf32>
    %cst_36 = arith.constant dense<0.000000e+00> : vector<2x8x8xf32>
    %98 = tpu.matmul %97, %84, %cst_36 {dimension_numbers = #tpu.dot_dimension_numbers<[2], [1], [1], [2], [0, 0, 0, 1, 1, 2], [0], [0]>} : vector<2x8x8xf32>, vector<2x8x8xf32>, vector<2x8x8xf32> -> vector<2x8x8xf32>
    %99 = vector.shape_cast %98 : vector<2x8x8xf32> to vector<16x8xf32>
    %c0_37 = arith.constant 0 : index
    %c16 = arith.constant 16 : index
    %100 = vector.load %arg21[%c0_37, %c16] : memref<16x32xf32, #tpu.memory_space<vmem>>, vector<16x8xf32>
    tpu.vector_store %arg21[%c0_37, %c16], %99 {strides = array<i32>} : memref<16x32xf32, #tpu.memory_space<vmem>>, vector<16x8xf32>,
    %101 = vector.extract_strided_slice %34 {offsets = [0, 24], sizes = [16, 8], strides = [1, 1]} : vector<16x96xf32> to vector<16x8xf32>
    %102 = vector.shape_cast %101 : vector<16x8xf32> to vector<2x8x8xf32>
    %103 = vector.extract_strided_slice %34 {offsets = [0, 56], sizes = [16, 8], strides = [1, 1]} : vector<16x96xf32> to vector<16x8xf32>
    %104 = vector.shape_cast %103 : vector<16x8xf32> to vector<2x8x8xf32>
    %105 = vector.extract_strided_slice %34 {offsets = [0, 88], sizes = [16, 8], strides = [1, 1]} : vector<16x96xf32> to vector<16x8xf32>
    %106 = vector.shape_cast %105 : vector<16x8xf32> to vector<2x8x8xf32>
    %cst_38 = arith.constant dense<0.000000e+00> : vector<2x8x8xf32>
    %107 = tpu.matmul %102, %104, %cst_38 {dimension_numbers = #tpu.dot_dimension_numbers<[2], [2], [1], [1], [0, 0, 0, 1, 1, 1], [0], [0]>} : vector<2x8x8xf32>, vector<2x8x8xf32>, vector<2x8x8xf32> -> vector<2x8x8xf32>
    %cst_39 = arith.constant 0.353553385 : f32
    %108 = vector.broadcast %cst_39 : f32 to vector<2x8x8xf32>
    %109 = arith.mulf %107, %108 : vector<2x8x8xf32>
    %110 = arith.addf %109, %27 : vector<2x8x8xf32>
    %cst_40 = arith.constant dense<0xFF800000> : vector<2x8xf32>
    %111 = vector.multi_reduction <maximumf>, %110, %cst_40 [2] : vector<2x8x8xf32> to vector<2x8xf32>
    %112 = vector.shape_cast %111 : vector<2x8xf32> to vector<2x8x1xf32>
    %113 = vector.broadcast %112 : vector<2x8x1xf32> to vector<2x8x8xf32>
    %114 = arith.subf %110, %113 : vector<2x8x8xf32>
    %115 = math.exp %114 : vector<2x8x8xf32>
    %cst_41 = arith.constant dense<0.000000e+00> : vector<2x8xf32>
    %116 = vector.multi_reduction <add>, %115, %cst_41 [2] : vector<2x8x8xf32> to vector<2x8xf32>
    %117 = vector.shape_cast %116 : vector<2x8xf32> to vector<2x8x1xf32>
    %118 = vector.broadcast %117 : vector<2x8x1xf32> to vector<2x8x8xf32>
    %119 = arith.divf %115, %118 : vector<2x8x8xf32>
    %cst_42 = arith.constant dense<0.000000e+00> : vector<2x8x8xf32>
    %120 = tpu.matmul %119, %106, %cst_42 {dimension_numbers = #tpu.dot_dimension_numbers<[2], [1], [1], [2], [0, 0, 0, 1, 1, 2], [0], [0]>} : vector<2x8x8xf32>, vector<2x8x8xf32>, vector<2x8x8xf32> -> vector<2x8x8xf32>
    %121 = vector.shape_cast %120 : vector<2x8x8xf32> to vector<16x8xf32>
    %c0_43 = arith.constant 0 : index
    %c24 = arith.constant 24 : index
    %122 = vector.load %arg21[%c0_43, %c24] : memref<16x32xf32, #tpu.memory_space<vmem>>, vector<16x8xf32>
    tpu.vector_store %arg21[%c0_43, %c24], %121 {strides = array<i32>} : memref<16x32xf32, #tpu.memory_space<vmem>>, vector<16x8xf32>,
    %c0_44 = arith.constant 0 : index
    %c0_45 = arith.constant 0 : index
    %123 = vector.load %arg21[%c0_44, %c0_45] : memref<16x32xf32, #tpu.memory_space<vmem>>, vector<16x32xf32>
    %c0_46 = arith.constant 0 : index
    %c0_47 = arith.constant 0 : index
    %c0_48 = arith.constant 0 : index
    %124 = vector.load %arg6[%c0_46, %c0_47, %c0_48] : memref<2x32x32xf32, #tpu.memory_space<vmem>>, vector<1x32x32xf32>
    %125 = vector.shape_cast %124 : vector<1x32x32xf32> to vector<32x32xf32>
    %cst_49 = arith.constant dense<0.000000e+00> : vector<16x32xf32>
    %126 = tpu.matmul %123, %125, %cst_49 {dimension_numbers = #tpu.dot_dimension_numbers<[1], [0], [0], [1], [0, 0, 1, 1], [], []>} : vector<16x32xf32>, vector<32x32xf32>, vector<16x32xf32> -> vector<16x32xf32>
    %c0_50 = arith.constant 0 : index
    %c0_51 = arith.constant 0 : index
    %c0_52 = arith.constant 0 : index
    %127 = vector.load %arg7[%c0_50, %c0_51, %c0_52] : memref<2x1x32xf32, #tpu.memory_space<vmem>>, vector<1x1x32xf32>
    %128 = vector.shape_cast %127 : vector<1x1x32xf32> to vector<1x32xf32>
    %129 = vector.broadcast %128 : vector<1x32xf32> to vector<16x32xf32>
    %130 = arith.addf %126, %129 : vector<16x32xf32>
    %131 = arith.addf %130, %24 : vector<16x32xf32>
    %c0_53 = arith.constant 0 : index
    %c0_54 = arith.constant 0 : index
    %c0_55 = arith.constant 0 : index
    %132 = vector.load %arg8[%c0_53, %c0_54, %c0_55] : memref<2x1x32xf32, #tpu.memory_space<vmem>>, vector<1x1x32xf32>
    %133 = vector.shape_cast %132 : vector<1x1x32xf32> to vector<1x32xf32>
    %c0_56 = arith.constant 0 : index
    %c0_57 = arith.constant 0 : index
    %c0_58 = arith.constant 0 : index
    %134 = vector.load %arg9[%c0_56, %c0_57, %c0_58] : memref<2x1x32xf32, #tpu.memory_space<vmem>>, vector<1x1x32xf32>
    %135 = vector.shape_cast %134 : vector<1x1x32xf32> to vector<1x32xf32>
    %cst_59 = arith.constant dense<0.000000e+00> : vector<16xf32>
    %136 = vector.multi_reduction <add>, %131, %cst_59 [1] : vector<16x32xf32> to vector<16xf32>
    %137 = vector.shape_cast %136 : vector<16xf32> to vector<16x1xf32>
    %cst_60 = arith.constant 3.200000e+01 : f32
    %138 = vector.broadcast %cst_60 : f32 to vector<16x1xf32>
    %139 = arith.divf %137, %138 : vector<16x1xf32>
    %140 = vector.broadcast %139 : vector<16x1xf32> to vector<16x32xf32>
    %141 = arith.subf %131, %140 : vector<16x32xf32>
    %142 = arith.mulf %141, %141 : vector<16x32xf32>
    %cst_61 = arith.constant dense<0.000000e+00> : vector<16xf32>
    %143 = vector.multi_reduction <add>, %142, %cst_61 [1] : vector<16x32xf32> to vector<16xf32>
    %144 = vector.shape_cast %143 : vector<16xf32> to vector<16x1xf32>
    %cst_62 = arith.constant 3.200000e+01 : f32
    %145 = vector.broadcast %cst_62 : f32 to vector<16x1xf32>
    %146 = arith.divf %144, %145 : vector<16x1xf32>
    %147 = vector.broadcast %139 : vector<16x1xf32> to vector<16x32xf32>
    %148 = arith.subf %131, %147 : vector<16x32xf32>
    %cst_63 = arith.constant 9.99999996E-13 : f32
    %149 = vector.broadcast %cst_63 : f32 to vector<16x1xf32>
    %150 = arith.addf %146, %149 : vector<16x1xf32>
    %151 = math.rsqrt %150 : vector<16x1xf32>
    %152 = vector.broadcast %151 : vector<16x1xf32> to vector<16x32xf32>
    %153 = arith.mulf %148, %152 : vector<16x32xf32>
    %154 = vector.broadcast %133 : vector<1x32xf32> to vector<16x32xf32>
    %155 = arith.mulf %153, %154 : vector<16x32xf32>
    %156 = vector.broadcast %135 : vector<1x32xf32> to vector<16x32xf32>
    %157 = arith.addf %155, %156 : vector<16x32xf32>
    %c0_64 = arith.constant 0 : index
    %c0_65 = arith.constant 0 : index
    %c0_66 = arith.constant 0 : index
    %158 = vector.load %arg10[%c0_64, %c0_65, %c0_66] : memref<2x32x64xf32, #tpu.memory_space<vmem>>, vector<1x32x64xf32>
    %159 = vector.shape_cast %158 : vector<1x32x64xf32> to vector<32x64xf32>
    %cst_67 = arith.constant dense<0.000000e+00> : vector<16x64xf32>
    %160 = tpu.matmul %157, %159, %cst_67 {dimension_numbers = #tpu.dot_dimension_numbers<[1], [0], [0], [1], [0, 0, 1, 1], [], []>} : vector<16x32xf32>, vector<32x64xf32>, vector<16x64xf32> -> vector<16x64xf32>
    %c0_68 = arith.constant 0 : index
    %c0_69 = arith.constant 0 : index
    %c0_70 = arith.constant 0 : index
    %161 = vector.load %arg11[%c0_68, %c0_69, %c0_70] : memref<2x1x64xf32, #tpu.memory_space<vmem>>, vector<1x1x64xf32>
    %162 = vector.shape_cast %161 : vector<1x1x64xf32> to vector<1x64xf32>
    %163 = vector.broadcast %162 : vector<1x64xf32> to vector<16x64xf32>
    %164 = arith.addf %160, %163 : vector<16x64xf32>
    %cst_71 = arith.constant 5.000000e-01 : f32
    %165 = vector.broadcast %cst_71 : f32 to vector<16x64xf32>
    %166 = arith.mulf %165, %164 : vector<16x64xf32>
    %cst_72 = arith.constant 0.707106769 : f32
    %167 = vector.broadcast %cst_72 : f32 to vector<16x64xf32>
    %168 = arith.mulf %164, %167 : vector<16x64xf32>
    %169 = math.erf %168 : vector<16x64xf32>
    %cst_73 = arith.constant 1.000000e+00 : f32
    %170 = vector.broadcast %cst_73 : f32 to vector<16x64xf32>
    %171 = arith.addf %170, %169 : vector<16x64xf32>
    %172 = arith.mulf %166, %171 : vector<16x64xf32>
    %c0_74 = arith.constant 0 : index
    %c0_75 = arith.constant 0 : index
    %c0_76 = arith.constant 0 : index
    %173 = vector.load %arg12[%c0_74, %c0_75, %c0_76] : memref<2x64x32xf32, #tpu.memory_space<vmem>>, vector<1x64x32xf32>
    %174 = vector.shape_cast %173 : vector<1x64x32xf32> to vector<64x32xf32>
    %cst_77 = arith.constant dense<0.000000e+00> : vector<16x32xf32>
    %175 = tpu.matmul %172, %174, %cst_77 {dimension_numbers = #tpu.dot_dimension_numbers<[1], [0], [0], [1], [0, 0, 1, 1], [], []>} : vector<16x64xf32>, vector<64x32xf32>, vector<16x32xf32> -> vector<16x32xf32>
    %c0_78 = arith.constant 0 : index
    %c0_79 = arith.constant 0 : index
    %c0_80 = arith.constant 0 : index
    %176 = vector.load %arg13[%c0_78, %c0_79, %c0_80] : memref<2x1x32xf32, #tpu.memory_space<vmem>>, vector<1x1x32xf32>
    %177 = vector.shape_cast %176 : vector<1x1x32xf32> to vector<1x32xf32>
    %178 = vector.broadcast %177 : vector<1x32xf32> to vector<16x32xf32>
    %179 = arith.addf %175, %178 : vector<16x32xf32>
    %180 = arith.addf %179, %157 : vector<16x32xf32>
    %c0_81 = arith.constant 0 : index
    %c0_82 = arith.constant 0 : index
    %c0_83 = arith.constant 0 : index
    %181 = vector.load %arg14[%c0_81, %c0_82, %c0_83] : memref<2x1x32xf32, #tpu.memory_space<vmem>>, vector<1x1x32xf32>
    %182 = vector.shape_cast %181 : vector<1x1x32xf32> to vector<1x32xf32>
    %c0_84 = arith.constant 0 : index
    %c0_85 = arith.constant 0 : index
    %c0_86 = arith.constant 0 : index
    %183 = vector.load %arg15[%c0_84, %c0_85, %c0_86] : memref<2x1x32xf32, #tpu.memory_space<vmem>>, vector<1x1x32xf32>
    %184 = vector.shape_cast %183 : vector<1x1x32xf32> to vector<1x32xf32>
    %cst_87 = arith.constant dense<0.000000e+00> : vector<16xf32>
    %185 = vector.multi_reduction <add>, %180, %cst_87 [1] : vector<16x32xf32> to vector<16xf32>
    %186 = vector.shape_cast %185 : vector<16xf32> to vector<16x1xf32>
    %cst_88 = arith.constant 3.200000e+01 : f32
    %187 = vector.broadcast %cst_88 : f32 to vector<16x1xf32>
    %188 = arith.divf %186, %187 : vector<16x1xf32>
    %189 = vector.broadcast %188 : vector<16x1xf32> to vector<16x32xf32>
    %190 = arith.subf %180, %189 : vector<16x32xf32>
    %191 = arith.mulf %190, %190 : vector<16x32xf32>
    %cst_89 = arith.constant dense<0.000000e+00> : vector<16xf32>
    %192 = vector.multi_reduction <add>, %191, %cst_89 [1] : vector<16x32xf32> to vector<16xf32>
    %193 = vector.shape_cast %192 : vector<16xf32> to vector<16x1xf32>
    %cst_90 = arith.constant 3.200000e+01 : f32
    %194 = vector.broadcast %cst_90 : f32 to vector<16x1xf32>
    %195 = arith.divf %193, %194 : vector<16x1xf32>
    %196 = vector.broadcast %188 : vector<16x1xf32> to vector<16x32xf32>
    %197 = arith.subf %180, %196 : vector<16x32xf32>
    %cst_91 = arith.constant 9.99999996E-13 : f32
    %198 = vector.broadcast %cst_91 : f32 to vector<16x1xf32>
    %199 = arith.addf %195, %198 : vector<16x1xf32>
    %200 = math.rsqrt %199 : vector<16x1xf32>
    %201 = vector.broadcast %200 : vector<16x1xf32> to vector<16x32xf32>
    %202 = arith.mulf %197, %201 : vector<16x32xf32>
    %203 = vector.broadcast %182 : vector<1x32xf32> to vector<16x32xf32>
    %204 = arith.mulf %202, %203 : vector<16x32xf32>
    %205 = vector.broadcast %184 : vector<1x32xf32> to vector<16x32xf32>
    %206 = arith.addf %204, %205 : vector<16x32xf32>
    %c1 = arith.constant 1 : index
    %c0_92 = arith.constant 0 : index
    %c0_93 = arith.constant 0 : index
    %207 = vector.load %arg4[%c1, %c0_92, %c0_93] : memref<2x32x96xf32, #tpu.memory_space<vmem>>, vector<1x32x96xf32>
    %208 = vector.shape_cast %207 : vector<1x32x96xf32> to vector<32x96xf32>
    %cst_94 = arith.constant dense<0.000000e+00> : vector<16x96xf32>
    %209 = tpu.matmul %206, %208, %cst_94 {dimension_numbers = #tpu.dot_dimension_numbers<[1], [0], [0], [1], [0, 0, 1, 1], [], []>} : vector<16x32xf32>, vector<32x96xf32>, vector<16x96xf32> -> vector<16x96xf32>
    %c1_95 = arith.constant 1 : index
    %c0_96 = arith.constant 0 : index
    %c0_97 = arith.constant 0 : index
    %210 = vector.load %arg5[%c1_95, %c0_96, %c0_97] : memref<2x1x96xf32, #tpu.memory_space<vmem>>, vector<1x1x96xf32>
    %211 = vector.shape_cast %210 : vector<1x1x96xf32> to vector<1x96xf32>
    %212 = vector.broadcast %211 : vector<1x96xf32> to vector<16x96xf32>
    %213 = arith.addf %209, %212 : vector<16x96xf32>
    %214 = vector.extract_strided_slice %213 {offsets = [0, 0], sizes = [16, 8], strides = [1, 1]} : vector<16x96xf32> to vector<16x8xf32>
    %215 = vector.shape_cast %214 : vector<16x8xf32> to vector<2x8x8xf32>
    %216 = vector.extract_strided_slice %213 {offsets = [0, 32], sizes = [16, 8], strides = [1, 1]} : vector<16x96xf32> to vector<16x8xf32>
    %217 = vector.shape_cast %216 : vector<16x8xf32> to vector<2x8x8xf32>
    %218 = vector.extract_strided_slice %213 {offsets = [0, 64], sizes = [16, 8], strides = [1, 1]} : vector<16x96xf32> to vector<16x8xf32>
    %219 = vector.shape_cast %218 : vector<16x8xf32> to vector<2x8x8xf32>
    %cst_98 = arith.constant dense<0.000000e+00> : vector<2x8x8xf32>
    %220 = tpu.matmul %215, %217, %cst_98 {dimension_numbers = #tpu.dot_dimension_numbers<[2], [2], [1], [1], [0, 0, 0, 1, 1, 1], [0], [0]>} : vector<2x8x8xf32>, vector<2x8x8xf32>, vector<2x8x8xf32> -> vector<2x8x8xf32>
    %cst_99 = arith.constant 0.353553385 : f32
    %221 = vector.broadcast %cst_99 : f32 to vector<2x8x8xf32>
    %222 = arith.mulf %220, %221 : vector<2x8x8xf32>
    %223 = arith.addf %222, %27 : vector<2x8x8xf32>
    %cst_100 = arith.constant dense<0xFF800000> : vector<2x8xf32>
    %224 = vector.multi_reduction <maximumf>, %223, %cst_100 [2] : vector<2x8x8xf32> to vector<2x8xf32>
    %225 = vector.shape_cast %224 : vector<2x8xf32> to vector<2x8x1xf32>
    %226 = vector.broadcast %225 : vector<2x8x1xf32> to vector<2x8x8xf32>
    %227 = arith.subf %223, %226 : vector<2x8x8xf32>
    %228 = math.exp %227 : vector<2x8x8xf32>
    %cst_101 = arith.constant dense<0.000000e+00> : vector<2x8xf32>
    %229 = vector.multi_reduction <add>, %228, %cst_101 [2] : vector<2x8x8xf32> to vector<2x8xf32>
    %230 = vector.shape_cast %229 : vector<2x8xf32> to vector<2x8x1xf32>
    %231 = vector.broadcast %230 : vector<2x8x1xf32> to vector<2x8x8xf32>
    %232 = arith.divf %228, %231 : vector<2x8x8xf32>
    %cst_102 = arith.constant dense<0.000000e+00> : vector<2x8x8xf32>
    %233 = tpu.matmul %232, %219, %cst_102 {dimension_numbers = #tpu.dot_dimension_numbers<[2], [1], [1], [2], [0, 0, 0, 1, 1, 2], [0], [0]>} : vector<2x8x8xf32>, vector<2x8x8xf32>, vector<2x8x8xf32> -> vector<2x8x8xf32>
    %234 = vector.shape_cast %233 : vector<2x8x8xf32> to vector<16x8xf32>
    %c0_103 = arith.constant 0 : index
    %c0_104 = arith.constant 0 : index
    %235 = vector.load %arg21[%c0_103, %c0_104] : memref<16x32xf32, #tpu.memory_space<vmem>>, vector<16x8xf32>
    tpu.vector_store %arg21[%c0_103, %c0_104], %234 {strides = array<i32>} : memref<16x32xf32, #tpu.memory_space<vmem>>, vector<16x8xf32>,
    %236 = vector.extract_strided_slice %213 {offsets = [0, 8], sizes = [16, 8], strides = [1, 1]} : vector<16x96xf32> to vector<16x8xf32>
    %237 = vector.shape_cast %236 : vector<16x8xf32> to vector<2x8x8xf32>
    %238 = vector.extract_strided_slice %213 {offsets = [0, 40], sizes = [16, 8], strides = [1, 1]} : vector<16x96xf32> to vector<16x8xf32>
    %239 = vector.shape_cast %238 : vector<16x8xf32> to vector<2x8x8xf32>
    %240 = vector.extract_strided_slice %213 {offsets = [0, 72], sizes = [16, 8], strides = [1, 1]} : vector<16x96xf32> to vector<16x8xf32>
    %241 = vector.shape_cast %240 : vector<16x8xf32> to vector<2x8x8xf32>
    %cst_105 = arith.constant dense<0.000000e+00> : vector<2x8x8xf32>
    %242 = tpu.matmul %237, %239, %cst_105 {dimension_numbers = #tpu.dot_dimension_numbers<[2], [2], [1], [1], [0, 0, 0, 1, 1, 1], [0], [0]>} : vector<2x8x8xf32>, vector<2x8x8xf32>, vector<2x8x8xf32> -> vector<2x8x8xf32>
    %cst_106 = arith.constant 0.353553385 : f32
    %243 = vector.broadcast %cst_106 : f32 to vector<2x8x8xf32>
    %244 = arith.mulf %242, %243 : vector<2x8x8xf32>
    %245 = arith.addf %244, %27 : vector<2x8x8xf32>
    %cst_107 = arith.constant dense<0xFF800000> : vector<2x8xf32>
    %246 = vector.multi_reduction <maximumf>, %245, %cst_107 [2] : vector<2x8x8xf32> to vector<2x8xf32>
    %247 = vector.shape_cast %246 : vector<2x8xf32> to vector<2x8x1xf32>
    %248 = vector.broadcast %247 : vector<2x8x1xf32> to vector<2x8x8xf32>
    %249 = arith.subf %245, %248 : vector<2x8x8xf32>
    %250 = math.exp %249 : vector<2x8x8xf32>
    %cst_108 = arith.constant dense<0.000000e+00> : vector<2x8xf32>
    %251 = vector.multi_reduction <add>, %250, %cst_108 [2] : vector<2x8x8xf32> to vector<2x8xf32>
    %252 = vector.shape_cast %251 : vector<2x8xf32> to vector<2x8x1xf32>
    %253 = vector.broadcast %252 : vector<2x8x1xf32> to vector<2x8x8xf32>
    %254 = arith.divf %250, %253 : vector<2x8x8xf32>
    %cst_109 = arith.constant dense<0.000000e+00> : vector<2x8x8xf32>
    %255 = tpu.matmul %254, %241, %cst_109 {dimension_numbers = #tpu.dot_dimension_numbers<[2], [1], [1], [2], [0, 0, 0, 1, 1, 2], [0], [0]>} : vector<2x8x8xf32>, vector<2x8x8xf32>, vector<2x8x8xf32> -> vector<2x8x8xf32>
    %256 = vector.shape_cast %255 : vector<2x8x8xf32> to vector<16x8xf32>
    %c0_110 = arith.constant 0 : index
    %c8_111 = arith.constant 8 : index
    %257 = vector.load %arg21[%c0_110, %c8_111] : memref<16x32xf32, #tpu.memory_space<vmem>>, vector<16x8xf32>
    tpu.vector_store %arg21[%c0_110, %c8_111], %256 {strides = array<i32>} : memref<16x32xf32, #tpu.memory_space<vmem>>, vector<16x8xf32>,
    %258 = vector.extract_strided_slice %213 {offsets = [0, 16], sizes = [16, 8], strides = [1, 1]} : vector<16x96xf32> to vector<16x8xf32>
    %259 = vector.shape_cast %258 : vector<16x8xf32> to vector<2x8x8xf32>
    %260 = vector.extract_strided_slice %213 {offsets = [0, 48], sizes = [16, 8], strides = [1, 1]} : vector<16x96xf32> to vector<16x8xf32>
    %261 = vector.shape_cast %260 : vector<16x8xf32> to vector<2x8x8xf32>
    %262 = vector.extract_strided_slice %213 {offsets = [0, 80], sizes = [16, 8], strides = [1, 1]} : vector<16x96xf32> to vector<16x8xf32>
    %263 = vector.shape_cast %262 : vector<16x8xf32> to vector<2x8x8xf32>
    %cst_112 = arith.constant dense<0.000000e+00> : vector<2x8x8xf32>
    %264 = tpu.matmul %259, %261, %cst_112 {dimension_numbers = #tpu.dot_dimension_numbers<[2], [2], [1], [1], [0, 0, 0, 1, 1, 1], [0], [0]>} : vector<2x8x8xf32>, vector<2x8x8xf32>, vector<2x8x8xf32> -> vector<2x8x8xf32>
    %cst_113 = arith.constant 0.353553385 : f32
    %265 = vector.broadcast %cst_113 : f32 to vector<2x8x8xf32>
    %266 = arith.mulf %264, %265 : vector<2x8x8xf32>
    %267 = arith.addf %266, %27 : vector<2x8x8xf32>
    %cst_114 = arith.constant dense<0xFF800000> : vector<2x8xf32>
    %268 = vector.multi_reduction <maximumf>, %267, %cst_114 [2] : vector<2x8x8xf32> to vector<2x8xf32>
    %269 = vector.shape_cast %268 : vector<2x8xf32> to vector<2x8x1xf32>
    %270 = vector.broadcast %269 : vector<2x8x1xf32> to vector<2x8x8xf32>
    %271 = arith.subf %267, %270 : vector<2x8x8xf32>
    %272 = math.exp %271 : vector<2x8x8xf32>
    %cst_115 = arith.constant dense<0.000000e+00> : vector<2x8xf32>
    %273 = vector.multi_reduction <add>, %272, %cst_115 [2] : vector<2x8x8xf32> to vector<2x8xf32>
    %274 = vector.shape_cast %273 : vector<2x8xf32> to vector<2x8x1xf32>
    %275 = vector.broadcast %274 : vector<2x8x1xf32> to vector<2x8x8xf32>
    %276 = arith.divf %272, %275 : vector<2x8x8xf32>
    %cst_116 = arith.constant dense<0.000000e+00> : vector<2x8x8xf32>
    %277 = tpu.matmul %276, %263, %cst_116 {dimension_numbers = #tpu.dot_dimension_numbers<[2], [1], [1], [2], [0, 0, 0, 1, 1, 2], [0], [0]>} : vector<2x8x8xf32>, vector<2x8x8xf32>, vector<2x8x8xf32> -> vector<2x8x8xf32>
    %278 = vector.shape_cast %277 : vector<2x8x8xf32> to vector<16x8xf32>
    %c0_117 = arith.constant 0 : index
    %c16_118 = arith.constant 16 : index
    %279 = vector.load %arg21[%c0_117, %c16_118] : memref<16x32xf32, #tpu.memory_space<vmem>>, vector<16x8xf32>
    tpu.vector_store %arg21[%c0_117, %c16_118], %278 {strides = array<i32>} : memref<16x32xf32, #tpu.memory_space<vmem>>, vector<16x8xf32>,
    %280 = vector.extract_strided_slice %213 {offsets = [0, 24], sizes = [16, 8], strides = [1, 1]} : vector<16x96xf32> to vector<16x8xf32>
    %281 = vector.shape_cast %280 : vector<16x8xf32> to vector<2x8x8xf32>
    %282 = vector.extract_strided_slice %213 {offsets = [0, 56], sizes = [16, 8], strides = [1, 1]} : vector<16x96xf32> to vector<16x8xf32>
    %283 = vector.shape_cast %282 : vector<16x8xf32> to vector<2x8x8xf32>
    %284 = vector.extract_strided_slice %213 {offsets = [0, 88], sizes = [16, 8], strides = [1, 1]} : vector<16x96xf32> to vector<16x8xf32>
    %285 = vector.shape_cast %284 : vector<16x8xf32> to vector<2x8x8xf32>
    %cst_119 = arith.constant dense<0.000000e+00> : vector<2x8x8xf32>
    %286 = tpu.matmul %281, %283, %cst_119 {dimension_numbers = #tpu.dot_dimension_numbers<[2], [2], [1], [1], [0, 0, 0, 1, 1, 1], [0], [0]>} : vector<2x8x8xf32>, vector<2x8x8xf32>, vector<2x8x8xf32> -> vector<2x8x8xf32>
    %cst_120 = arith.constant 0.353553385 : f32
    %287 = vector.broadcast %cst_120 : f32 to vector<2x8x8xf32>
    %288 = arith.mulf %286, %287 : vector<2x8x8xf32>
    %289 = arith.addf %288, %27 : vector<2x8x8xf32>
    %cst_121 = arith.constant dense<0xFF800000> : vector<2x8xf32>
    %290 = vector.multi_reduction <maximumf>, %289, %cst_121 [2] : vector<2x8x8xf32> to vector<2x8xf32>
    %291 = vector.shape_cast %290 : vector<2x8xf32> to vector<2x8x1xf32>
    %292 = vector.broadcast %291 : vector<2x8x1xf32> to vector<2x8x8xf32>
    %293 = arith.subf %289, %292 : vector<2x8x8xf32>
    %294 = math.exp %293 : vector<2x8x8xf32>
    %cst_122 = arith.constant dense<0.000000e+00> : vector<2x8xf32>
    %295 = vector.multi_reduction <add>, %294, %cst_122 [2] : vector<2x8x8xf32> to vector<2x8xf32>
    %296 = vector.shape_cast %295 : vector<2x8xf32> to vector<2x8x1xf32>
    %297 = vector.broadcast %296 : vector<2x8x1xf32> to vector<2x8x8xf32>
    %298 = arith.divf %294, %297 : vector<2x8x8xf32>
    %cst_123 = arith.constant dense<0.000000e+00> : vector<2x8x8xf32>
    %299 = tpu.matmul %298, %285, %cst_123 {dimension_numbers = #tpu.dot_dimension_numbers<[2], [1], [1], [2], [0, 0, 0, 1, 1, 2], [0], [0]>} : vector<2x8x8xf32>, vector<2x8x8xf32>, vector<2x8x8xf32> -> vector<2x8x8xf32>
    %300 = vector.shape_cast %299 : vector<2x8x8xf32> to vector<16x8xf32>
    %c0_124 = arith.constant 0 : index
    %c24_125 = arith.constant 24 : index
    %301 = vector.load %arg21[%c0_124, %c24_125] : memref<16x32xf32, #tpu.memory_space<vmem>>, vector<16x8xf32>
    tpu.vector_store %arg21[%c0_124, %c24_125], %300 {strides = array<i32>} : memref<16x32xf32, #tpu.memory_space<vmem>>, vector<16x8xf32>,
    %c0_126 = arith.constant 0 : index
    %c0_127 = arith.constant 0 : index
    %302 = vector.load %arg21[%c0_126, %c0_127] : memref<16x32xf32, #tpu.memory_space<vmem>>, vector<16x32xf32>
    %c1_128 = arith.constant 1 : index
    %c0_129 = arith.constant 0 : index
    %c0_130 = arith.constant 0 : index
    %303 = vector.load %arg6[%c1_128, %c0_129, %c0_130] : memref<2x32x32xf32, #tpu.memory_space<vmem>>, vector<1x32x32xf32>
    %304 = vector.shape_cast %303 : vector<1x32x32xf32> to vector<32x32xf32>
    %cst_131 = arith.constant dense<0.000000e+00> : vector<16x32xf32>
    %305 = tpu.matmul %302, %304, %cst_131 {dimension_numbers = #tpu.dot_dimension_numbers<[1], [0], [0], [1], [0, 0, 1, 1], [], []>} : vector<16x32xf32>, vector<32x32xf32>, vector<16x32xf32> -> vector<16x32xf32>
    %c1_132 = arith.constant 1 : index
    %c0_133 = arith.constant 0 : index
    %c0_134 = arith.constant 0 : index
    %306 = vector.load %arg7[%c1_132, %c0_133, %c0_134] : memref<2x1x32xf32, #tpu.memory_space<vmem>>, vector<1x1x32xf32>
    %307 = vector.shape_cast %306 : vector<1x1x32xf32> to vector<1x32xf32>
    %308 = vector.broadcast %307 : vector<1x32xf32> to vector<16x32xf32>
    %309 = arith.addf %305, %308 : vector<16x32xf32>
    %310 = arith.addf %309, %206 : vector<16x32xf32>
    %c1_135 = arith.constant 1 : index
    %c0_136 = arith.constant 0 : index
    %c0_137 = arith.constant 0 : index
    %311 = vector.load %arg8[%c1_135, %c0_136, %c0_137] : memref<2x1x32xf32, #tpu.memory_space<vmem>>, vector<1x1x32xf32>
    %312 = vector.shape_cast %311 : vector<1x1x32xf32> to vector<1x32xf32>
    %c1_138 = arith.constant 1 : index
    %c0_139 = arith.constant 0 : index
    %c0_140 = arith.constant 0 : index
    %313 = vector.load %arg9[%c1_138, %c0_139, %c0_140] : memref<2x1x32xf32, #tpu.memory_space<vmem>>, vector<1x1x32xf32>
    %314 = vector.shape_cast %313 : vector<1x1x32xf32> to vector<1x32xf32>
    %cst_141 = arith.constant dense<0.000000e+00> : vector<16xf32>
    %315 = vector.multi_reduction <add>, %310, %cst_141 [1] : vector<16x32xf32> to vector<16xf32>
    %316 = vector.shape_cast %315 : vector<16xf32> to vector<16x1xf32>
    %cst_142 = arith.constant 3.200000e+01 : f32
    %317 = vector.broadcast %cst_142 : f32 to vector<16x1xf32>
    %318 = arith.divf %316, %317 : vector<16x1xf32>
    %319 = vector.broadcast %318 : vector<16x1xf32> to vector<16x32xf32>
    %320 = arith.subf %310, %319 : vector<16x32xf32>
    %321 = arith.mulf %320, %320 : vector<16x32xf32>
    %cst_143 = arith.constant dense<0.000000e+00> : vector<16xf32>
    %322 = vector.multi_reduction <add>, %321, %cst_143 [1] : vector<16x32xf32> to vector<16xf32>
    %323 = vector.shape_cast %322 : vector<16xf32> to vector<16x1xf32>
    %cst_144 = arith.constant 3.200000e+01 : f32
    %324 = vector.broadcast %cst_144 : f32 to vector<16x1xf32>
    %325 = arith.divf %323, %324 : vector<16x1xf32>
    %326 = vector.broadcast %318 : vector<16x1xf32> to vector<16x32xf32>
    %327 = arith.subf %310, %326 : vector<16x32xf32>
    %cst_145 = arith.constant 9.99999996E-13 : f32
    %328 = vector.broadcast %cst_145 : f32 to vector<16x1xf32>
    %329 = arith.addf %325, %328 : vector<16x1xf32>
    %330 = math.rsqrt %329 : vector<16x1xf32>
    %331 = vector.broadcast %330 : vector<16x1xf32> to vector<16x32xf32>
    %332 = arith.mulf %327, %331 : vector<16x32xf32>
    %333 = vector.broadcast %312 : vector<1x32xf32> to vector<16x32xf32>
    %334 = arith.mulf %332, %333 : vector<16x32xf32>
    %335 = vector.broadcast %314 : vector<1x32xf32> to vector<16x32xf32>
    %336 = arith.addf %334, %335 : vector<16x32xf32>
    %c1_146 = arith.constant 1 : index
    %c0_147 = arith.constant 0 : index
    %c0_148 = arith.constant 0 : index
    %337 = vector.load %arg10[%c1_146, %c0_147, %c0_148] : memref<2x32x64xf32, #tpu.memory_space<vmem>>, vector<1x32x64xf32>
    %338 = vector.shape_cast %337 : vector<1x32x64xf32> to vector<32x64xf32>
    %cst_149 = arith.constant dense<0.000000e+00> : vector<16x64xf32>
    %339 = tpu.matmul %336, %338, %cst_149 {dimension_numbers = #tpu.dot_dimension_numbers<[1], [0], [0], [1], [0, 0, 1, 1], [], []>} : vector<16x32xf32>, vector<32x64xf32>, vector<16x64xf32> -> vector<16x64xf32>
    %c1_150 = arith.constant 1 : index
    %c0_151 = arith.constant 0 : index
    %c0_152 = arith.constant 0 : index
    %340 = vector.load %arg11[%c1_150, %c0_151, %c0_152] : memref<2x1x64xf32, #tpu.memory_space<vmem>>, vector<1x1x64xf32>
    %341 = vector.shape_cast %340 : vector<1x1x64xf32> to vector<1x64xf32>
    %342 = vector.broadcast %341 : vector<1x64xf32> to vector<16x64xf32>
    %343 = arith.addf %339, %342 : vector<16x64xf32>
    %cst_153 = arith.constant 5.000000e-01 : f32
    %344 = vector.broadcast %cst_153 : f32 to vector<16x64xf32>
    %345 = arith.mulf %344, %343 : vector<16x64xf32>
    %cst_154 = arith.constant 0.707106769 : f32
    %346 = vector.broadcast %cst_154 : f32 to vector<16x64xf32>
    %347 = arith.mulf %343, %346 : vector<16x64xf32>
    %348 = math.erf %347 : vector<16x64xf32>
    %cst_155 = arith.constant 1.000000e+00 : f32
    %349 = vector.broadcast %cst_155 : f32 to vector<16x64xf32>
    %350 = arith.addf %349, %348 : vector<16x64xf32>
    %351 = arith.mulf %345, %350 : vector<16x64xf32>
    %c1_156 = arith.constant 1 : index
    %c0_157 = arith.constant 0 : index
    %c0_158 = arith.constant 0 : index
    %352 = vector.load %arg12[%c1_156, %c0_157, %c0_158] : memref<2x64x32xf32, #tpu.memory_space<vmem>>, vector<1x64x32xf32>
    %353 = vector.shape_cast %352 : vector<1x64x32xf32> to vector<64x32xf32>
    %cst_159 = arith.constant dense<0.000000e+00> : vector<16x32xf32>
    %354 = tpu.matmul %351, %353, %cst_159 {dimension_numbers = #tpu.dot_dimension_numbers<[1], [0], [0], [1], [0, 0, 1, 1], [], []>} : vector<16x64xf32>, vector<64x32xf32>, vector<16x32xf32> -> vector<16x32xf32>
    %c1_160 = arith.constant 1 : index
    %c0_161 = arith.constant 0 : index
    %c0_162 = arith.constant 0 : index
    %355 = vector.load %arg13[%c1_160, %c0_161, %c0_162] : memref<2x1x32xf32, #tpu.memory_space<vmem>>, vector<1x1x32xf32>
    %356 = vector.shape_cast %355 : vector<1x1x32xf32> to vector<1x32xf32>
    %357 = vector.broadcast %356 : vector<1x32xf32> to vector<16x32xf32>
    %358 = arith.addf %354, %357 : vector<16x32xf32>
    %359 = arith.addf %358, %336 : vector<16x32xf32>
    %c1_163 = arith.constant 1 : index
    %c0_164 = arith.constant 0 : index
    %c0_165 = arith.constant 0 : index
    %360 = vector.load %arg14[%c1_163, %c0_164, %c0_165] : memref<2x1x32xf32, #tpu.memory_space<vmem>>, vector<1x1x32xf32>
    %361 = vector.shape_cast %360 : vector<1x1x32xf32> to vector<1x32xf32>
    %c1_166 = arith.constant 1 : index
    %c0_167 = arith.constant 0 : index
    %c0_168 = arith.constant 0 : index
    %362 = vector.load %arg15[%c1_166, %c0_167, %c0_168] : memref<2x1x32xf32, #tpu.memory_space<vmem>>, vector<1x1x32xf32>
    %363 = vector.shape_cast %362 : vector<1x1x32xf32> to vector<1x32xf32>
    %cst_169 = arith.constant dense<0.000000e+00> : vector<16xf32>
    %364 = vector.multi_reduction <add>, %359, %cst_169 [1] : vector<16x32xf32> to vector<16xf32>
    %365 = vector.shape_cast %364 : vector<16xf32> to vector<16x1xf32>
    %cst_170 = arith.constant 3.200000e+01 : f32
    %366 = vector.broadcast %cst_170 : f32 to vector<16x1xf32>
    %367 = arith.divf %365, %366 : vector<16x1xf32>
    %368 = vector.broadcast %367 : vector<16x1xf32> to vector<16x32xf32>
    %369 = arith.subf %359, %368 : vector<16x32xf32>
    %370 = arith.mulf %369, %369 : vector<16x32xf32>
    %cst_171 = arith.constant dense<0.000000e+00> : vector<16xf32>
    %371 = vector.multi_reduction <add>, %370, %cst_171 [1] : vector<16x32xf32> to vector<16xf32>
    %372 = vector.shape_cast %371 : vector<16xf32> to vector<16x1xf32>
    %cst_172 = arith.constant 3.200000e+01 : f32
    %373 = vector.broadcast %cst_172 : f32 to vector<16x1xf32>
    %374 = arith.divf %372, %373 : vector<16x1xf32>
    %375 = vector.broadcast %367 : vector<16x1xf32> to vector<16x32xf32>
    %376 = arith.subf %359, %375 : vector<16x32xf32>
    %cst_173 = arith.constant 9.99999996E-13 : f32
    %377 = vector.broadcast %cst_173 : f32 to vector<16x1xf32>
    %378 = arith.addf %374, %377 : vector<16x1xf32>
    %379 = math.rsqrt %378 : vector<16x1xf32>
    %380 = vector.broadcast %379 : vector<16x1xf32> to vector<16x32xf32>
    %381 = arith.mulf %376, %380 : vector<16x32xf32>
    %382 = vector.broadcast %361 : vector<1x32xf32> to vector<16x32xf32>
    %383 = arith.mulf %381, %382 : vector<16x32xf32>
    %384 = vector.broadcast %363 : vector<1x32xf32> to vector<16x32xf32>
    %385 = arith.addf %383, %384 : vector<16x32xf32>
    %386 = vector.extract_strided_slice %385 {offsets = [0, 0], sizes = [1, 32], strides = [1, 1]} : vector<16x32xf32> to vector<1x32xf32>
    %387 = vector.extract_strided_slice %385 {offsets = [8, 0], sizes = [1, 32], strides = [1, 1]} : vector<16x32xf32> to vector<1x32xf32>
    %388 = tpu.concatenate %386, %387 in 0 : vector<1x32xf32>, vector<1x32xf32> -> vector<2x32xf32>
    %c0_174 = arith.constant 0 : index
    %c0_175 = arith.constant 0 : index
    %389 = vector.load %arg16[%c0_174, %c0_175] : memref<32x32xf32, #tpu.memory_space<vmem>>, vector<32x32xf32>
    %cst_176 = arith.constant dense<0.000000e+00> : vector<2x32xf32>
    %390 = tpu.matmul %388, %389, %cst_176 {dimension_numbers = #tpu.dot_dimension_numbers<[1], [0], [0], [1], [0, 0, 1, 1], [], []>} : vector<2x32xf32>, vector<32x32xf32>, vector<2x32xf32> -> vector<2x32xf32>
    %c0_177 = arith.constant 0 : index
    %c0_178 = arith.constant 0 : index
    %391 = vector.load %arg17[%c0_177, %c0_178] : memref<1x32xf32, #tpu.memory_space<vmem>>, vector<1x32xf32>
    %392 = vector.broadcast %391 : vector<1x32xf32> to vector<2x32xf32>
    %393 = arith.addf %390, %392 : vector<2x32xf32>
    %394 = math.tanh %393 : vector<2x32xf32>
    %c0_179 = arith.constant 0 : index
    %c0_180 = arith.constant 0 : index
    %395 = vector.load %arg18[%c0_179, %c0_180] : memref<32x3xf32, #tpu.memory_space<vmem>>, vector<32x3xf32>
    %cst_181 = arith.constant dense<0.000000e+00> : vector<2x3xf32>
    %396 = tpu.matmul %394, %395, %cst_181 {dimension_numbers = #tpu.dot_dimension_numbers<[1], [0], [0], [1], [0, 0, 1, 1], [], []>} : vector<2x32xf32>, vector<32x3xf32>, vector<2x3xf32> -> vector<2x3xf32>
    %c0_182 = arith.constant 0 : index
    %c0_183 = arith.constant 0 : index
    %397 = vector.load %arg19[%c0_182, %c0_183] : memref<1x3xf32, #tpu.memory_space<vmem>>, vector<1x3xf32>
    %398 = vector.broadcast %397 : vector<1x3xf32> to vector<2x3xf32>
    %399 = arith.addf %396, %398 : vector<2x3xf32>
    %c0_184 = arith.constant 0 : index
    %c0_185 = arith.constant 0 : index
    %400 = vector.load %arg20[%c0_184, %c0_185] : memref<2x3xf32, #tpu.memory_space<vmem>>, vector<2x3xf32>
    tpu.vector_store %arg20[%c0_184, %c0_185], %399 {strides = array<i32>} : memref<2x3xf32, #tpu.memory_space<vmem>>, vector<2x3xf32>,
    return
  }
}

</mosaic_0001>

<bundles_post_ra>
// kernel: bert_classification_forward.1
= control target key start
LH: loop header
LB: loop body
LE: loop exit
PB: predicated region body
PF: predicated region fallthrough
CT: control target
= control target key end

     0   :  { %s5439_s0 = inlined_call_operand.vmem [shape: f32[16,32], index: 0, kind: input, shape index: {}]   ;;  %s5440_s1 = inlined_call_operand.vmem [shape: f32[2,1,8], index: 1, kind: input, shape index: {}]   ;;  %s5441_s2 = inlined_call_operand.vmem [shape: f32[1,32], index: 2, kind: input, shape index: {}]   ;;  %s5442_s3 = inlined_call_operand.vmem [shape: f32[1,32], index: 3, kind: input, shape index: {}]   ;;  %s5443_s4 = inlined_call_operand.vmem [shape: f32[2,32,96], index: 4, kind: input, shape index: {}]   ;;  %s5444_s5 = inlined_call_operand.vmem [shape: f32[2,1,96], index: 5, kind: input, shape index: {}]   ;;  %s5445_s6 = inlined_call_operand.vmem [shape: f32[2,32,32], index: 6, kind: input, shape index: {}]   ;;  %s5446_s7 = inlined_call_operand.vmem [shape: f32[2,1,32], index: 7, kind: input, shape index: {}]   ;;  %s5447_s8 = inlined_call_operand.vmem [shape: f32[2,1,32], index: 8, kind: input, shape index: {}]   ;;  %s5448_s9 = inlined_call_operand.vmem [shape: f32[2,1,32], index: 9, kind: input, shape index: {}]   ;;  %s5449_s10 = inlined_call_operand.vmem [shape: f32[2,32,64], index: 10, kind: input, shape index: {}]   ;;  %s5450_s11 = inlined_call_operand.vmem [shape: f32[2,1,64], index: 11, kind: input, shape index: {}]   ;;  %s5451_s12 = inlined_call_operand.vmem [shape: f32[2,64,32], index: 12, kind: input, shape index: {}]   ;;  %s5452_s13 = inlined_call_operand.vmem [shape: f32[2,1,32], index: 13, kind: input, shape index: {}]   ;;  %s5453_s14 = inlined_call_operand.vmem [shape: f32[2,1,32], index: 14, kind: input, shape index: {}]   ;;  %s5454_s15 = inlined_call_operand.vmem [shape: f32[2,1,32], index: 15, kind: input, shape index: {}]   ;;  %s5455_s16 = inlined_call_operand.vmem [shape: f32[32,32], index: 16, kind: input, shape index: {}]   ;;  %s5456_s17 = inlined_call_operand.vmem [shape: f32[1,32], index: 17, kind: input, shape index: {}]   ;;  %s5457_s18 = inlined_call_operand.vmem [shape: f32[32,3], index: 18, kind: input, shape index: {}]   ;;  %s5458_s19 = inlined_call_operand.vmem [shape: f32[1,3], index: 19, kind: input, shape index: {}]   ;;  %s5459_s20 = inlined_call_operand.hbm [shape: f32[2,3], index: 20, kind: output, shape index: {}]  }
   0x1   :  { %5481 = sst [smem:[#allocation6_spill]] %s5439_s0 }
   0x2   :  { %5482 = sst [smem:[#allocation7_spill]] %s5440_s1 }
   0x3   :  { %5483 = sst [smem:[#allocation8_spill]] %s5441_s2 }
   0x4   :  { %5484 = sst [smem:[#allocation9_spill]] %s5442_s3 }
   0x5   :  { %5485 = sst [smem:[#allocation10_spill]] %s5443_s4 }
   0x6   :  { %s5486_s23 = sld [smem:[#allocation6_spill]]  ;;  %vm70_vm0 = vcmask 261120  }
   0xc   :  { %v66_v0 = vld [vmem:[%s5486_s23] sm:$0xff]  ;;  %v67_v1 = vld [vmem:[%s5486_s23 + $0x8] sm:$0xff] }
   0xd   :  { %25 = vsyncpa [#allocation4], 0  ;;  %v71_v2 = vsel %vm70_vm0, %v66_v0, 0.0  ;;  %v74_v3 = vsel %vm70_vm0, %v67_v1, 0.0  ;;  %s5487_s26 = sld [smem:[#allocation10_spill]]  ;;  %v4686_v34 = vmov 0.0  }
   0xe   :  { %72 = vadd.xlane.f32.xlu0 %v71_v2  ;;  %s5488_s22 = sld [smem:[#allocation8_spill]]  ;;  %4276 = vmatprep.subr.mxu1 %v4686_v34  ;;  %vm4687_vm1 = vmmov 0   ;;  %v4023_v35 = vld [vmem:[%s5444_s5] ss:$0 sm:$0xff]  ;;  %s4688_s27 = smov 96   ;;  %vm223_vm2 = vcmask 64512  }
   0xf   :  { %s5489_s2 = sld [smem:[#allocation9_spill]]  ;;  %4278 = vmatprep.mubr.msk.f32.mxu1 %vm4687_vm1, %v4686_v34  ;;  %s4689_s21 = smov 64   ;;  %vm897_vm3 = vcmask 130112   ;;  %vm1242_vm4 = vcmask 195712   ;;  %vm1587_vm5 = vcmask 261312   ;;  %vm1847_vm6 = vcmask 523264  }
  0x10   :  { %s5490_s29 = sld [smem:[#allocation7_spill]]  ;;  %s4690_s1 = smov 88   ;;  %vm3832_vm7 = vcmask 1040384   ;;  %vm4003_vm8 = vcmask 17408  }
  0x11   :  { %s4692_s23 = smov 56   ;;  %s5477_s24 = smov 80  }
  0x12   :  { %75 = vadd.xlane.f32.xlu0 %v74_v3  ;;  %s5473_s25 = smov 48   ;;  %s5471_s3 = smov 72  }
  0x13   :  { %v131_v14 = vld [vmem:[%s5487_s26 + $0x18] sm:$0xff]  ;;  %v130_v15 = vld [vmem:[%s5487_s26 + $0x10] sm:$0xff]  ;;  %v129_v16 = vld [vmem:[%s5487_s26 + $0x8] sm:$0xff]  ;;  %s5469_s28 = smov 104   ;;  %s5465_s4 = smov 40  }
  0x14   :  { %4265 = vmatprep.subr.mxu0 %v131_v14  ;;  %v128_v17 = vld [vmem:[%s5487_s26] sm:$0xff]  ;;  %s5463_s30 = smov 8   ;;  %s5467_s0 = smov 16  }
  0x15   :  { %4266 = vmatpush3.msra.mxu0 %v131_v14  ;;  %v4019_v25 = vld [vmem:[%s5488_s22] ss:$0 sm:$0xff]  ;;  %s4691_s22 = smov 120  }
  0x16   :  { %4267 = vmatprep.subr.mxu0 %v130_v15  ;;  %v4020_v27 = vld [vmem:[%s5489_s2] ss:$0 sm:$0xff]  ;;  %v4882_v48 = vld [vmem:[%s5490_s29 + $0x1] ss:$0 sm:$0xff]  ;;  %s5475_s2 = smov 112  }
  0x17   :  { %4268 = vmatpush3.msra.mxu0 %v130_v15  ;;  %v4876_v43 = vld [vmem:[%s5490_s29] ss:$0 sm:$0xff] }
  0x18   :  { %4269 = vmatprep.subr.mxu0 %v129_v16 }
  0x19   :  { %4270 = vmatpush3.msra.mxu0 %v129_v16 }
  0x1a   :  { %4271 = vmatprep.subr.mxu0 %v128_v17 }
  0x1b   :  { %4272 = vmatpush3.msra.mxu0 %v128_v17 }
  0x1c   :  { %4286 = vmatprep.subr.mxu0 %v4686_v34 }
  0x97   :  { %v73_v4 = vpop.xlane.xlu0 %72 }
  0x98   :  { %v78_v5 = vmul.f32 0.03125, %v73_v4 }
  0x9a   :  { %v80_v6 = vsub.f32 %v66_v0, %v78_v5 }
  0x9b   :  { %v76_v7 = vpop.xlane.xlu0 %75 }
  0x9c   :  { %v79_v8 = vmul.f32 0.03125, %v76_v7  ;;  %v82_v9 = vmul.f32 %v80_v6, %v80_v6 }
  0x9e   :  { %v81_v10 = vsub.f32 %v67_v1, %v79_v8  ;;  %v84_v11 = vsel %vm70_vm0, %v82_v9, 0.0 }
  0x9f   :  { %85 = vadd.xlane.f32.xlu1 %v84_v11 }
  0xa0   :  { %v83_v12 = vmul.f32 %v81_v10, %v81_v10 }
  0xa2   :  { %v87_v13 = vsel %vm70_vm0, %v83_v12, 0.0 }
  0xa3   :  { %88 = vadd.xlane.f32.xlu1 %v87_v13 }
 0x128   :  { %v86_v18 = vpop.xlane.xlu1 %85 }
 0x129   :  { %v90_v19 = vmul.f32 0.03125, %v86_v18 }
 0x12b   :  { %v92_v20 = vadd.f32 1e-12, %v90_v19 }
 0x12c   :  { %v89_v21 = vpop.xlane.xlu1 %88 }
 0x12d   :  { %4568 = vrsqrt.f32 %v92_v20  ;;  %v91_v22 = vmul.f32 0.03125, %v89_v21 }
 0x12f   :  { %v93_v23 = vadd.f32 1e-12, %v91_v22 }
 0x131   :  { %4570 = vrsqrt.f32 %v93_v23 }
 0x13a   :  { %v4569_v24 = vpop.eup %4568 }
 0x13b   :  { %v96_v26 = vmul.f32 %v4569_v24, %v80_v6 }
 0x13d   :  { %v104_v28 = vmul.f32 %v4019_v25, %v96_v26 }
 0x13e   :  { %v4571_v29 = vpop.eup %4570 }
 0x13f   :  { %v97_v30 = vmul.f32 %v4571_v29, %v81_v10  ;;  %v4836_v31 = vadd.f32 %v4020_v27, %v104_v28 }
 0x141   :  { %v105_v32 = vmul.f32 %v4019_v25, %v97_v30  ;;  %4273 = vmatprep.mubr.msk.f32.mxu0 %vm70_vm0, %v4836_v31 }
 0x143   :  { %v4840_v33 = vadd.f32 %v4020_v27, %v105_v32 }
 0x145   :  { %4274 = vmatmul.mubr.msk.f32.vlgmr.msra.gmra.mxu0 %vm70_vm0, %v4840_v33 }
 0x146   :  { %4288 = vmatprep.mubr.msk.f32.mxu0 %vm4687_vm1, %v4686_v34 }
 0x205   :  { %v4275_v36 = vpop.f32.mrf.mxu0 }
 0x206   :  { %v4853_v37 = vadd.f32 %v4275_v36, %v4023_v35 }
 0x207   :  { %v211_v38 = vpop.f32.mrf.mxu0 }
 0x208   :  { %v4855_v39 = vadd.f32 %v4023_v35, %v211_v38  ;;  %299 = vrot.lane.b32.xlu1 %v4853_v37, %s4688_s27 }
 0x20a   :  { %221 = vrot.lane.b32.xlu0 %v4855_v39, %s4688_s27 }
 0x27a   :  { %v300_v41 = vpop.permute.xlu1 %299 }
 0x27c   :  { %v222_v40 = vpop.permute.xlu0 %221 }
 0x27d   :  { %4277 = vmatpush3.xpose.msk.msra.mxu1 %vm223_vm2, %v222_v40 }
 0x27e   :  { %4281 = vmatprep.subr.mxu1 %v4686_v34 }
 0x280   :  { %4279 = vmatmul.mubr.msk.f32.vlgmr.msra.gmra.mxu1 %vm223_vm2, %v4855_v39 }
 0x281   :  { %4282 = vmatpush3.xpose.msk.msra.mxu1 %vm223_vm2, %v300_v41  ;;  %4283 = vmatprep.mubr.msk.f32.mxu1 %vm4687_vm1, %v4686_v34 }
 0x282   :  { %4291 = vmatprep.subr.mxu1 %v4686_v34 }
 0x284   :  { %4284 = vmatmul.mubr.msk.f32.vlgmr.msra.gmra.mxu1 %vm223_vm2, %v4853_v37 }
 0x285   :  { %4293 = vmatprep.mubr.msk.f32.mxu1 %vm4687_vm1, %v4686_v34 }
 0x340   :  { %v294_v42 = vpop.f32.mrf.mxu1 }
 0x341   :  { %v375_v44 = vmul.f32 0.35355338, %v294_v42 }
 0x342   :  { %v4280_v45 = vpop.f32.mrf.mxu1 }
 0x343   :  { %v377_v46 = vadd.f32 %v4876_v43, %v375_v44 }
 0x344   :  { %v371_v47 = vpop.f32.mrf.mxu1 }
 0x345   :  { %v376_v49 = vmul.f32 0.35355338, %v371_v47  ;;  %v379_v50 = vsel %vm223_vm2, %v377_v46, -inf }
 0x346   :  { %380 = vmax.xlane.f32.xlu1 %v379_v50  ;;  %v4285_v51 = vpop.f32.mrf.mxu1 }
 0x347   :  { %v378_v52 = vadd.f32 %v4882_v48, %v376_v49 }
 0x349   :  { %v382_v53 = vsel %vm223_vm2, %v378_v52, -inf }
 0x34a   :  { %383 = vmax.xlane.f32.xlu0 %v382_v53 }
 0x357   :  { %477 = vrot.lane.b32.xlu1 %v4853_v37, %s4689_s21 }
 0x35b   :  { %557 = vrot.lane.b32.xlu1 %v4855_v39, %s4690_s1 }
 0x35f   :  { %635 = vrot.lane.b32.xlu1 %v4853_v37, %s4690_s1 }
 0x3cf   :  { %v381_v54 = vpop.xlane.xlu1 %380 }
 0x3d0   :  { %v385_v55 = vsub.f32 %v377_v46, %v381_v54 }
 0x3d2   :  { %v387_v56 = vmul.f32 1.442695, %v385_v55 }
 0x3d3   :  { %v478_v57 = vpop.permute.xlu1 %477  ;;  %v384_v58 = vpop.xlane.xlu0 %383 }
 0x3d4   :  { %4572 = vpow2.f32 %v387_v56  ;;  %v386_v59 = vsub.f32 %v378_v52, %v384_v58  ;;  %4292 = vmatpush3.msra.mxu1 %v478_v57 }
 0x3d5   :  { %4301 = vmatprep.subr.mxu1 %v4686_v34 }
 0x3d6   :  { %v389_v60 = vmul.f32 1.442695, %v386_v59 }
 0x3d7   :  { %v558_v1 = vpop.permute.xlu1 %557 }
 0x3d8   :  { %4574 = vpow2.f32 %v389_v60 }
 0x3db   :  { %v636_v2 = vpop.permute.xlu1 %635 }
 0x3e1   :  { %v4573_v61 = vpop.eup %4572 }
 0x3e2   :  { %v391_v62 = vsel %vm223_vm2, %v4573_v61, 0.0 }
 0x3e3   :  { %392 = vadd.xlane.f32.xlu0 %v391_v62 }
 0x3e5   :  { %v4575_v63 = vpop.eup %4574 }
 0x3e6   :  { %v394_v0 = vsel %vm223_vm2, %v4575_v63, 0.0 }
 0x3e7   :  { %395 = vadd.xlane.f32.xlu1 %v394_v0 }
 0x3f8   :  { %633 = vrot.lane.b32.xlu1 %v4853_v37, %s4691_s22 }
 0x3f9   :  { %401 = vrot.lane.b32.xlu0 %v4855_v39, %s4689_s21 }
 0x3fd   :  { %555 = vrot.lane.b32.xlu0 %v4855_v39, %s4691_s22 }
 0x46c   :  { %v393_v3 = vpop.xlane.xlu0 %392 }
 0x46d   :  { %4576 = vrcp.f32 %v393_v3 }
 0x470   :  { %v396_v4 = vpop.xlane.xlu1 %395  ;;  %v402_v5 = vpop.permute.xlu0 %401 }
 0x471   :  { %4578 = vrcp.f32 %v396_v4  ;;  %4287 = vmatpush3.msra.mxu0 %v402_v5 }
 0x472   :  { %4296 = vmatprep.subr.mxu0 %v4686_v34 }
 0x474   :  { %v556_v10 = vpop.permute.xlu0 %555  ;;  %v634_v11 = vpop.permute.xlu1 %633 }
 0x47a   :  { %v4577_v6 = vpop.eup %4576 }
 0x47b   :  { %v398_v7 = vmul.f32 %v4577_v6, %v4573_v61 }
 0x47d   :  { %4289 = vmatmul.mubr.msk.f32.vlgmr.msra.gmra.mxu0 %vm223_vm2, %v398_v7 }
 0x47e   :  { %v4579_v8 = vpop.eup %4578  ;;  %4297 = vmatpush3.xpose.msk.msra.mxu0 %vm223_vm2, %v558_v1  ;;  %4298 = vmatprep.mubr.msk.f32.mxu0 %vm4687_vm1, %v4686_v34 }
 0x47f   :  { %v400_v9 = vmul.f32 %v4579_v8, %v4575_v63  ;;  %4306 = vmatprep.subr.mxu0 %v4686_v34 }
 0x481   :  { %4294 = vmatmul.mubr.msk.f32.vlgmr.msra.gmra.mxu1 %vm223_vm2, %v400_v9  ;;  %4299 = vmatmul.mubr.msk.f32.vlgmr.msra.gmra.mxu0 %vm223_vm2, %v556_v10 }
 0x482   :  { %4302 = vmatpush3.xpose.msk.msra.mxu1 %vm223_vm2, %v636_v2  ;;  %4303 = vmatprep.mubr.msk.f32.mxu1 %vm4687_vm1, %v4686_v34 }
 0x483   :  { %4311 = vmatprep.subr.mxu1 %v4686_v34  ;;  %4308 = vmatprep.mubr.msk.f32.mxu0 %vm4687_vm1, %v4686_v34 }
 0x485   :  { %4304 = vmatmul.mubr.msk.f32.vlgmr.msra.gmra.mxu1 %vm223_vm2, %v634_v11 }
 0x486   :  { %4313 = vmatprep.mubr.msk.f32.mxu1 %vm4687_vm1, %v4686_v34 }
 0x53d   :  { %v473_v12 = vpop.f32.mrf.mxu0 }
 0x53e   :  { %553 = vst.msk [vmem:[#allocation2] sm:$0xff] %vm223_vm2, %v473_v12 }
 0x53f   :  { %v4290_v13 = vpop.f32.mrf.mxu0 }
 0x541   :  { %v549_v14 = vpop.f32.mrf.mxu1  ;;  %v629_v15 = vpop.f32.mrf.mxu0 }
 0x542   :  { %554 = vst.msk [vmem:[#allocation2 + $0x8] sm:$0xff] %vm223_vm2, %v549_v14  ;;  %v711_v16 = vmul.f32 0.35355338, %v629_v15 }
 0x543   :  { %v4295_v17 = vpop.f32.mrf.mxu1  ;;  %v4300_v18 = vpop.f32.mrf.mxu0 }
 0x544   :  { %v713_v19 = vadd.f32 %v4876_v43, %v711_v16 }
 0x545   :  { %v707_v20 = vpop.f32.mrf.mxu1 }
 0x546   :  { %v712_v21 = vmul.f32 0.35355338, %v707_v20  ;;  %v715_v22 = vsel %vm223_vm2, %v713_v19, -inf }
 0x547   :  { %716 = vmax.xlane.f32.xlu0 %v715_v22  ;;  %v4305_v23 = vpop.f32.mrf.mxu1 }
 0x548   :  { %v714_v24 = vadd.f32 %v4882_v48, %v712_v21 }
 0x54a   :  { %v718_v25 = vsel %vm223_vm2, %v714_v24, -inf }
 0x54b   :  { %719 = vmax.xlane.f32.xlu1 %v718_v25 }
 0x55c   :  { %813 = vrot.lane.b32.xlu1 %v4853_v37, %s4692_s23 }
 0x55d   :  { %737 = vrot.lane.b32.xlu0 %v4855_v39, %s4692_s23 }
 0x560   :  { %902 = vrot.lane.b32.xlu1 %v4855_v39, %s5477_s24 }
 0x564   :  { %980 = vrot.lane.b32.xlu1 %v4853_v37, %s5477_s24  ;;  %s5495_s24 = smov 104  }
 0x568   :  { %978 = vrot.lane.b32.xlu1 %v4853_v37, %s5475_s2 }
 0x5d0   :  { %v717_v26 = vpop.xlane.xlu0 %716 }
 0x5d1   :  { %v721_v27 = vsub.f32 %v713_v19, %v717_v26 }
 0x5d3   :  { %v723_v28 = vmul.f32 1.442695, %v721_v27 }
 0x5d4   :  { %v738_v29 = vpop.permute.xlu0 %737  ;;  %v720_v30 = vpop.xlane.xlu1 %719 }
 0x5d5   :  { %4580 = vpow2.f32 %v723_v28  ;;  %v722_v32 = vsub.f32 %v714_v24, %v720_v30  ;;  %4307 = vmatpush3.msra.mxu0 %v738_v29 }
 0x5d6   :  { %4316 = vmatprep.subr.mxu0 %v4686_v34 }
 0x5d7   :  { %v725_v35 = vmul.f32 1.442695, %v722_v32 }
 0x5d8   :  { %v814_v36 = vpop.permute.xlu1 %813 }
 0x5d9   :  { %4582 = vpow2.f32 %v725_v35  ;;  %4312 = vmatpush3.msra.mxu1 %v814_v36 }
 0x5da   :  { %4321 = vmatprep.subr.mxu1 %v4686_v34 }
 0x5dc   :  { %v903_v46 = vpop.permute.xlu1 %902 }
 0x5e0   :  { %v981_v51 = vpop.permute.xlu1 %980 }
 0x5e2   :  { %v4581_v38 = vpop.eup %4580 }
 0x5e3   :  { %v727_v40 = vsel %vm223_vm2, %v4581_v38, 0.0 }
 0x5e4   :  { %728 = vadd.xlane.f32.xlu0 %v727_v40  ;;  %v979_v54 = vpop.permute.xlu1 %978 }
 0x5e6   :  { %v4583_v41 = vpop.eup %4582 }
 0x5e7   :  { %v730_v42 = vsel %vm223_vm2, %v4583_v41, 0.0 }
 0x5e8   :  { %731 = vadd.xlane.f32.xlu0 %v730_v42 }
 0x5fe   :  { %900 = vrot.lane.b32.xlu0 %v4855_v39, %s5475_s2  ;;  %s5496_s2 = smov 40  }
 0x66d   :  { %v729_v44 = vpop.xlane.xlu0 %728 }
 0x66e   :  { %4584 = vrcp.f32 %v729_v44 }
 0x671   :  { %v732_v45 = vpop.xlane.xlu0 %731 }
 0x672   :  { %4586 = vrcp.f32 %v732_v45 }
 0x675   :  { %v901_v53 = vpop.permute.xlu0 %900 }
 0x67b   :  { %v4585_v47 = vpop.eup %4584 }
 0x67c   :  { %v734_v49 = vmul.f32 %v4585_v47, %v4581_v38 }
 0x67e   :  { %4309 = vmatmul.mubr.msk.f32.vlgmr.msra.gmra.mxu0 %vm223_vm2, %v734_v49 }
 0x67f   :  { %v4587_v50 = vpop.eup %4586  ;;  %4317 = vmatpush3.xpose.msk.msra.mxu0 %vm223_vm2, %v903_v46  ;;  %4318 = vmatprep.mubr.msk.f32.mxu0 %vm4687_vm1, %v4686_v34 }
 0x680   :  { %v736_v52 = vmul.f32 %v4587_v50, %v4583_v41  ;;  %4326 = vmatprep.subr.mxu0 %v4686_v34 }
 0x682   :  { %4314 = vmatmul.mubr.msk.f32.vlgmr.msra.gmra.mxu1 %vm223_vm2, %v736_v52  ;;  %4319 = vmatmul.mubr.msk.f32.vlgmr.msra.gmra.mxu0 %vm223_vm2, %v901_v53 }
 0x683   :  { %4322 = vmatpush3.xpose.msk.msra.mxu1 %vm223_vm2, %v981_v51  ;;  %4323 = vmatprep.mubr.msk.f32.mxu1 %vm4687_vm1, %v4686_v34 }
 0x684   :  { %4331 = vmatprep.subr.mxu1 %v4686_v34  ;;  %4328 = vmatprep.mubr.msk.f32.mxu0 %vm4687_vm1, %v4686_v34 }
 0x686   :  { %4324 = vmatmul.mubr.msk.f32.vlgmr.msra.gmra.mxu1 %vm223_vm2, %v979_v54 }
 0x687   :  { %4333 = vmatprep.mubr.msk.f32.mxu1 %vm4687_vm1, %v4686_v34 }
 0x73e   :  { %v4957_v55 = vpop.f32.mrf.mxu0 }
 0x740   :  { %v4310_v56 = vpop.f32.mrf.mxu0 }
 0x742   :  { %v4959_v57 = vpop.f32.mrf.mxu1  ;;  %v974_v58 = vpop.f32.mrf.mxu0 }
 0x743   :  { %v1056_v59 = vmul.f32 0.35355338, %v974_v58 }
 0x744   :  { %v4315_v60 = vpop.f32.mrf.mxu1  ;;  %v4320_v61 = vpop.f32.mrf.mxu0 }
 0x745   :  { %v1058_v62 = vadd.f32 %v4876_v43, %v1056_v59 }
 0x746   :  { %v1052_v63 = vpop.f32.mrf.mxu1 }
 0x747   :  { %v1057_v0 = vmul.f32 0.35355338, %v1052_v63  ;;  %v1060_v1 = vsel %vm223_vm2, %v1058_v62, -inf }
 0x748   :  { %1061 = vmax.xlane.f32.xlu0 %v1060_v1  ;;  %v4325_v2 = vpop.f32.mrf.mxu1 }
 0x749   :  { %v1059_v3 = vadd.f32 %v4882_v48, %v1057_v0 }
 0x74b   :  { %v1063_v4 = vsel %vm223_vm2, %v1059_v3, -inf }
 0x74c   :  { %1064 = vmax.xlane.f32.xlu1 %v1063_v4 }
 0x75d   :  { %1158 = vrot.lane.b32.xlu1 %v4853_v37, %s5473_s25 }
 0x75e   :  { %1082 = vrot.lane.b32.xlu0 %v4855_v39, %s5473_s25  ;;  %s5497_s25 = smov 8  }
 0x761   :  { %1247 = vrot.lane.b32.xlu1 %v4855_v39, %s5471_s3 }
 0x765   :  { %1325 = vrot.lane.b32.xlu1 %v4853_v37, %s5471_s3  ;;  %s5498_s3 = smov 16  }
 0x769   :  { %1323 = vrot.lane.b32.xlu1 %v4853_v37, %s5469_s28 }
 0x7d1   :  { %v1062_v5 = vpop.xlane.xlu0 %1061 }
 0x7d2   :  { %v1066_v6 = vsub.f32 %v1058_v62, %v1062_v5  ;;  %v1594_v5 = vld [vmem:[%s5445_s6 + $0x10] sm:$0xff] }
 0x7d4   :  { %v1068_v7 = vmul.f32 1.442695, %v1066_v6  ;;  %v1593_v6 = vld [vmem:[%s5445_s6 + $0x8] sm:$0xff] }
 0x7d5   :  { %v1083_v8 = vpop.permute.xlu0 %1082  ;;  %v1065_v9 = vpop.xlane.xlu1 %1064 }
 0x7d6   :  { %4588 = vpow2.f32 %v1068_v7  ;;  %v1067_v10 = vsub.f32 %v1059_v3, %v1065_v9  ;;  %4327 = vmatpush3.msra.mxu0 %v1083_v8  ;;  %v1592_v7 = vld [vmem:[%s5445_s6] sm:$0xff] }
 0x7d7   :  { %4336 = vmatprep.subr.mxu0 %v4686_v34 }
 0x7d8   :  { %v1070_v11 = vmul.f32 1.442695, %v1067_v10 }
 0x7d9   :  { %v1159_v12 = vpop.permute.xlu1 %1158 }
 0x7da   :  { %4590 = vpow2.f32 %v1070_v11  ;;  %4332 = vmatpush3.msra.mxu1 %v1159_v12 }
 0x7db   :  { %4341 = vmatprep.subr.mxu1 %v4686_v34 }
 0x7dd   :  { %v1248_v19 = vpop.permute.xlu1 %1247 }
 0x7e1   :  { %v1326_v23 = vpop.permute.xlu1 %1325 }
 0x7e3   :  { %v4589_v13 = vpop.eup %4588 }
 0x7e4   :  { %v1072_v14 = vsel %vm223_vm2, %v4589_v13, 0.0 }
 0x7e5   :  { %1073 = vadd.xlane.f32.xlu0 %v1072_v14  ;;  %v1324_v26 = vpop.permute.xlu1 %1323 }
 0x7e7   :  { %v4591_v15 = vpop.eup %4590 }
 0x7e8   :  { %v1075_v16 = vsel %vm223_vm2, %v4591_v15, 0.0 }
 0x7e9   :  { %1076 = vadd.xlane.f32.xlu0 %v1075_v16  ;;  %v4050_v16 = vld [vmem:[%s5446_s7] ss:$0 sm:$0xff] }
 0x7ff   :  { %1245 = vrot.lane.b32.xlu0 %v4855_v39, %s5469_s28 }
 0x86e   :  { %v1074_v17 = vpop.xlane.xlu0 %1073 }
 0x86f   :  { %4592 = vrcp.f32 %v1074_v17 }
 0x872   :  { %v1077_v18 = vpop.xlane.xlu0 %1076 }
 0x873   :  { %4594 = vrcp.f32 %v1077_v18 }
 0x876   :  { %v1246_v25 = vpop.permute.xlu0 %1245 }
 0x87c   :  { %v4593_v20 = vpop.eup %4592 }
 0x87d   :  { %v1079_v21 = vmul.f32 %v4593_v20, %v4589_v13 }
 0x87f   :  { %4329 = vmatmul.mubr.msk.f32.vlgmr.msra.gmra.mxu0 %vm223_vm2, %v1079_v21 }
 0x880   :  { %v4595_v22 = vpop.eup %4594  ;;  %4337 = vmatpush3.xpose.msk.msra.mxu0 %vm223_vm2, %v1248_v19  ;;  %4338 = vmatprep.mubr.msk.f32.mxu0 %vm4687_vm1, %v4686_v34 }
 0x881   :  { %v1081_v24 = vmul.f32 %v4595_v22, %v4591_v15  ;;  %4346 = vmatprep.subr.mxu0 %v4686_v34 }
 0x883   :  { %4334 = vmatmul.mubr.msk.f32.vlgmr.msra.gmra.mxu1 %vm223_vm2, %v1081_v24  ;;  %4339 = vmatmul.mubr.msk.f32.vlgmr.msra.gmra.mxu0 %vm223_vm2, %v1246_v25 }
 0x884   :  { %4342 = vmatpush3.xpose.msk.msra.mxu1 %vm223_vm2, %v1326_v23  ;;  %4343 = vmatprep.mubr.msk.f32.mxu1 %vm4687_vm1, %v4686_v34 }
 0x885   :  { %4351 = vmatprep.subr.mxu1 %v4686_v34  ;;  %4348 = vmatprep.mubr.msk.f32.mxu0 %vm4687_vm1, %v4686_v34 }
 0x887   :  { %4344 = vmatmul.mubr.msk.f32.vlgmr.msra.gmra.mxu1 %vm223_vm2, %v1324_v26 }
 0x888   :  { %4353 = vmatprep.mubr.msk.f32.mxu1 %vm4687_vm1, %v4686_v34 }
 0x93f   :  { %v1154_v27 = vpop.f32.mrf.mxu0 }
 0x941   :  { %v4330_v28 = vpop.f32.mrf.mxu0 }
 0x943   :  { %v1230_v29 = vpop.f32.mrf.mxu1  ;;  %v1319_v30 = vpop.f32.mrf.mxu0 }
 0x944   :  { %v1401_v32 = vmul.f32 0.35355338, %v1319_v30 }
 0x945   :  { %v4335_v35 = vpop.f32.mrf.mxu1  ;;  %v4340_v36 = vpop.f32.mrf.mxu0 }
 0x946   :  { %v1403_v38 = vadd.f32 %v4876_v43, %v1401_v32 }
 0x947   :  { %v1397_v40 = vpop.f32.mrf.mxu1 }
 0x948   :  { %v1402_v41 = vmul.f32 0.35355338, %v1397_v40  ;;  %v1405_v42 = vsel %vm223_vm2, %v1403_v38, -inf  ;;  %v1731_v40 = vld [vmem:[%s5449_s10 + $0x8] sm:$0xff] }
 0x949   :  { %1406 = vmax.xlane.f32.xlu0 %v1405_v42  ;;  %v4345_v44 = vpop.f32.mrf.mxu1 }
 0x94a   :  { %v1404_v45 = vadd.f32 %v4882_v48, %v1402_v41  ;;  %v1730_v41 = vld [vmem:[%s5449_s10] sm:$0xff] }
 0x94c   :  { %v1408_v46 = vsel %vm223_vm2, %v1404_v45, -inf }
 0x94d   :  { %1409 = vmax.xlane.f32.xlu1 %v1408_v46 }
 0x95e   :  { %1503 = vrot.lane.b32.xlu1 %v4853_v37, %s5465_s4 }
 0x962   :  { %891 = vrot.lane.b32.xlu1 %v4957_v55, %s5463_s30 }
 0x966   :  { %893 = vrot.lane.b32.xlu1 %v4959_v57, %s5463_s30 }
 0x96a   :  { %1238 = vrot.lane.b32.xlu1 %v1230_v29, %s5467_s0 }
 0x9d2   :  { %v1407_v47 = vpop.xlane.xlu0 %1406 }
 0x9d3   :  { %v1411_v49 = vsub.f32 %v1403_v38, %v1407_v47  ;;  %v1732_v38 = vld [vmem:[%s5449_s10 + $0x10] sm:$0xff] }
 0x9d5   :  { %v1413_v50 = vmul.f32 1.442695, %v1411_v49 }
 0x9d6   :  { %v1410_v51 = vpop.xlane.xlu1 %1409 }
 0x9d7   :  { %4596 = vpow2.f32 %v1413_v50  ;;  %v1412_v52 = vsub.f32 %v1404_v45, %v1410_v51  ;;  %v4053_v51 = vld [vmem:[%s5447_s8] ss:$0 sm:$0xff] }
 0x9d9   :  { %v1415_v53 = vmul.f32 1.442695, %v1412_v52 }
 0x9da   :  { %v1504_v54 = vpop.permute.xlu1 %1503 }
 0x9db   :  { %4598 = vpow2.f32 %v1415_v53  ;;  %4352 = vmatpush3.msra.mxu1 %v1504_v54  ;;  %v4054_v53 = vld [vmem:[%s5448_s9] ss:$0 sm:$0xff] }
 0x9de   :  { %v892_v37 = vpop.permute.xlu1 %891 }
 0x9df   :  { %898 = vst.msk [vmem:[#allocation2] sm:$0xff] %vm897_vm3, %v892_v37 }
 0x9e2   :  { %v894_v55 = vpop.permute.xlu1 %893 }
 0x9e3   :  { %899 = vst.msk [vmem:[#allocation2 + $0x8] sm:$0xff] %vm897_vm3, %v894_v55 }
 0x9e4   :  { %v4597_v56 = vpop.eup %4596 }
 0x9e5   :  { %v1417_v57 = vsel %vm223_vm2, %v4597_v56, 0.0 }
 0x9e6   :  { %1418 = vadd.xlane.f32.xlu0 %v1417_v57  ;;  %v1239_v58 = vpop.permute.xlu1 %1238 }
 0x9e7   :  { %1244 = vst.msk [vmem:[#allocation2 + $0x8] sm:$0xff] %vm1242_vm4, %v1239_v58 }
 0x9e8   :  { %v4599_v59 = vpop.eup %4598 }
 0x9e9   :  { %v1420_v60 = vsel %vm223_vm2, %v4599_v59, 0.0 }
 0x9ea   :  { %1421 = vadd.xlane.f32.xlu0 %v1420_v60  ;;  %v1838_v60 = vld [vmem:[%s5451_s12 + $0x30] sm:$0xff] }
 0xa00   :  { %1427 = vrot.lane.b32.xlu0 %v4855_v39, %s5465_s4  ;;  %v1595_v39 = vld [vmem:[%s5445_s6 + $0x18] sm:$0xff]  ;;  %s5479_s4 = smov 24  }
 0xa04   :  { %1236 = vrot.lane.b32.xlu0 %v1154_v27, %s5467_s0  ;;  %s5492_s0 = smov 112  }
 0xa6f   :  { %v1419_v61 = vpop.xlane.xlu0 %1418 }
 0xa70   :  { %4600 = vrcp.f32 %v1419_v61  ;;  %v1837_v61 = vld [vmem:[%s5451_s12 + $0x28] sm:$0xff] }
 0xa73   :  { %v1422_v62 = vpop.xlane.xlu0 %1421 }
 0xa74   :  { %4602 = vrcp.f32 %v1422_v62  ;;  %v1836_v62 = vld [vmem:[%s5451_s12 + $0x20] sm:$0xff] }
 0xa77   :  { %v1428_v63 = vpop.permute.xlu0 %1427 }
 0xa78   :  { %4347 = vmatpush3.msra.mxu0 %v1428_v63  ;;  %v1835_v63 = vld [vmem:[%s5451_s12 + $0x18] sm:$0xff] }
 0xa79   :  { %4356 = vmatprep.subr.mxu0 %v1595_v39 }
 0xa7b   :  { %v1237_v0 = vpop.permute.xlu0 %1236 }
 0xa7c   :  { %1243 = vst.msk [vmem:[#allocation2] sm:$0xff] %vm1242_vm4, %v1237_v0  ;;  %v1834_v0 = vld [vmem:[%s5451_s12 + $0x10] sm:$0xff] }
 0xa7d   :  { %v4601_v1 = vpop.eup %4600 }
 0xa7e   :  { %v1424_v2 = vmul.f32 %v4601_v1, %v4597_v56  ;;  %v1833_v1 = vld [vmem:[%s5451_s12 + $0x8] sm:$0xff] }
 0xa80   :  { %4349 = vmatmul.mubr.msk.f32.vlgmr.msra.gmra.mxu0 %vm223_vm2, %v1424_v2  ;;  %v1832_v2 = vld [vmem:[%s5451_s12] sm:$0xff] }
 0xa81   :  { %v4603_v3 = vpop.eup %4602  ;;  %4357 = vmatpush3.msra.mxu0 %v1595_v39 }
 0xa82   :  { %v1426_v4 = vmul.f32 %v4603_v3, %v4599_v59  ;;  %4358 = vmatprep.subr.mxu0 %v1594_v5  ;;  %v1839_v59 = vld [vmem:[%s5451_s12 + $0x38] sm:$0xff]  ;;  %v4055_v3 = vld [vmem:[%s5450_s11] ss:$0 sm:$0xff] }
 0xa83   :  { %4359 = vmatpush3.msra.mxu0 %v1594_v5 }
 0xa84   :  { %4354 = vmatmul.mubr.msk.f32.vlgmr.msra.gmra.mxu1 %vm223_vm2, %v1426_v4  ;;  %4360 = vmatprep.subr.mxu0 %v1593_v6 }
 0xa85   :  { %4361 = vmatpush3.msra.mxu0 %v1593_v6 }
 0xa86   :  { %4362 = vmatprep.subr.mxu0 %v1592_v7 }
 0xa87   :  { %4363 = vmatpush3.msra.mxu0 %v1592_v7 }
 0xa88   :  { %4378 = vmatprep.subr.mxu0 %v1839_v59 }
 0xb40   :  { %v1499_v8 = vpop.f32.mrf.mxu0 }
 0xb41   :  { %1581 = vrot.lane.b32.xlu0 %v1499_v8, %s5479_s4 }
 0xb42   :  { %v4350_v9 = vpop.f32.mrf.mxu0 }
 0xb44   :  { %v1575_v10 = vpop.f32.mrf.mxu1 }
 0xb45   :  { %1583 = vrot.lane.b32.xlu1 %v1575_v10, %s5479_s4 }
 0xb46   :  { %v4355_v11 = vpop.f32.mrf.mxu1 }
 0xbb3   :  { %v1582_v12 = vpop.permute.xlu0 %1581 }
 0xbb4   :  { %1588 = vst.msk [vmem:[#allocation2] sm:$0xff] %vm1587_vm5, %v1582_v12 }
 0xbb7   :  { %v1584_v13 = vpop.permute.xlu1 %1583 }
 0xbb8   :  { %1589 = vst.msk [vmem:[#allocation2 + $0x8] sm:$0xff] %vm1587_vm5, %v1584_v13 }
 0xbbb   :  { %v1590_v14 = vld [vmem:[#allocation2] sm:$0xff] }
 0xbbc   :  { %4364 = vmatprep.mubr.msk.f32.mxu0 %vm70_vm0, %v1590_v14 }
 0xbbf   :  { %v1591_v15 = vld [vmem:[#allocation2 + $0x8] sm:$0xff] }
 0xbc0   :  { %4365 = vmatmul.mubr.msk.f32.vlgmr.msra.gmra.mxu0 %vm70_vm0, %v1591_v15 }
 0xbc1   :  { %4379 = vmatpush3.msra.mxu0 %v1839_v59 }
 0xbc2   :  { %4380 = vmatprep.subr.mxu0 %v1838_v60 }
 0xbc3   :  { %4381 = vmatpush3.msra.mxu0 %v1838_v60  ;;  %v4068_v60 = vld [vmem:[%s5444_s5 + $0x1] ss:$0 sm:$0xff] }
 0xbc4   :  { %4382 = vmatprep.subr.mxu0 %v1837_v61 }
 0xbc5   :  { %4383 = vmatpush3.msra.mxu0 %v1837_v61 }
 0xbc6   :  { %4384 = vmatprep.subr.mxu0 %v1836_v62 }
 0xbc7   :  { %4385 = vmatpush3.msra.mxu0 %v1836_v62 }
 0xbc8   :  { %4386 = vmatprep.subr.mxu0 %v1835_v63 }
 0xbc9   :  { %4387 = vmatpush3.msra.mxu0 %v1835_v63 }
 0xbca   :  { %4388 = vmatprep.subr.mxu0 %v1834_v0 }
 0xbcb   :  { %4389 = vmatpush3.msra.mxu0 %v1834_v0 }
 0xbcc   :  { %4390 = vmatprep.subr.mxu0 %v1833_v1 }
 0xbcd   :  { %4391 = vmatpush3.msra.mxu0 %v1833_v1 }
 0xbce   :  { %4392 = vmatprep.subr.mxu0 %v1832_v2 }
 0xbcf   :  { %4393 = vmatpush3.msra.mxu0 %v1832_v2 }
 0xbd0   :  { %4418 = vmatprep.subr.mxu0 %v4686_v34 }
 0xc80   :  { %v4366_v17 = vpop.f32.mrf.mxu0 }
 0xc81   :  { %v1681_v18 = vadd.f32 %v4366_v17, %v4050_v16  ;;  %v4058_v17 = vld [vmem:[%s5452_s13] ss:$0 sm:$0xff] }
 0xc82   :  { %v1675_v19 = vpop.f32.mrf.mxu0 }
 0xc83   :  { %v1676_v20 = vadd.f32 %v4050_v16, %v1675_v19  ;;  %v1685_v21 = vadd.f32 %v1681_v18, %v4840_v33 }
 0xc85   :  { %v1691_v22 = vsel %vm70_vm0, %v1685_v21, 0.0  ;;  %v1684_v23 = vadd.f32 %v1676_v20, %v4836_v31  ;;  %v1733_v31 = vld [vmem:[%s5449_s10 + $0x18] sm:$0xff] }
 0xc86   :  { %1692 = vadd.xlane.f32.xlu1 %v1691_v22  ;;  %4367 = vmatprep.subr.mxu1 %v1733_v31 }
 0xc87   :  { %v1688_v24 = vsel %vm70_vm0, %v1684_v23, 0.0  ;;  %4368 = vmatpush3.msra.mxu1 %v1733_v31 }
 0xc88   :  { %1689 = vadd.xlane.f32.xlu0 %v1688_v24  ;;  %4369 = vmatprep.subr.mxu1 %v1732_v38 }
 0xc89   :  { %4370 = vmatpush3.msra.mxu1 %v1732_v38  ;;  %v4066_v38 = vld [vmem:[%s5487_s26 + $0x38] sm:$0xff] }
 0xc8a   :  { %4371 = vmatprep.subr.mxu1 %v1731_v40 }
 0xc8b   :  { %4372 = vmatpush3.msra.mxu1 %v1731_v40  ;;  %v4065_v40 = vld [vmem:[%s5487_s26 + $0x30] sm:$0xff] }
 0xc8c   :  { %4373 = vmatprep.subr.mxu1 %v1730_v41 }
 0xc8d   :  { %4374 = vmatpush3.msra.mxu1 %v1730_v41  ;;  %v4064_v41 = vld [vmem:[%s5487_s26 + $0x28] sm:$0xff] }
 0xc8e   :  { %4397 = vmatprep.subr.mxu1 %v4066_v38 }
 0xd0f   :  { %v1693_v25 = vpop.xlane.xlu1 %1692 }
 0xd10   :  { %v1695_v26 = vmul.f32 0.03125, %v1693_v25 }
 0xd11   :  { %v1690_v27 = vpop.xlane.xlu0 %1689 }
 0xd12   :  { %v1694_v28 = vmul.f32 0.03125, %v1690_v27  ;;  %v1697_v29 = vsub.f32 %v1685_v21, %v1695_v26 }
 0xd14   :  { %v1696_v30 = vsub.f32 %v1684_v23, %v1694_v28  ;;  %v1699_v36 = vmul.f32 %v1697_v29, %v1697_v29 }
 0xd16   :  { %v1698_v32 = vmul.f32 %v1696_v30, %v1696_v30  ;;  %v1703_v33 = vsel %vm70_vm0, %v1699_v36, 0.0 }
 0xd18   :  { %v1700_v35 = vsel %vm70_vm0, %v1698_v32, 0.0 }
 0xd19   :  { %1701 = vadd.xlane.f32.xlu0 %v1700_v35 }
 0xd1d   :  { %1704 = vadd.xlane.f32.xlu0 %v1703_v33 }
 0xda2   :  { %v1702_v42 = vpop.xlane.xlu0 %1701 }
 0xda3   :  { %v1706_v44 = vmul.f32 0.03125, %v1702_v42  ;;  %v4063_v42 = vld [vmem:[%s5487_s26 + $0x20] sm:$0xff] }
 0xda5   :  { %v1708_v45 = vadd.f32 1e-12, %v1706_v44 }
 0xda6   :  { %v1705_v46 = vpop.xlane.xlu0 %1704 }
 0xda7   :  { %4604 = vrsqrt.f32 %v1708_v45  ;;  %v1707_v47 = vmul.f32 0.03125, %v1705_v46 }
 0xda9   :  { %v1709_v49 = vadd.f32 1e-12, %v1707_v47 }
 0xdab   :  { %4606 = vrsqrt.f32 %v1709_v49 }
 0xdb4   :  { %v4605_v50 = vpop.eup %4604 }
 0xdb5   :  { %v1712_v52 = vmul.f32 %v4605_v50, %v1696_v30 }
 0xdb7   :  { %v1720_v54 = vmul.f32 %v4053_v51, %v1712_v52  ;;  %v4061_v52 = vld [vmem:[%s5453_s14] ss:$0 sm:$0xff] }
 0xdb8   :  { %v4607_v37 = vpop.eup %4606 }
 0xdb9   :  { %v1713_v55 = vmul.f32 %v4607_v37, %v1697_v29  ;;  %v1728_v56 = vadd.f32 %v4054_v53, %v1720_v54 }
 0xdbb   :  { %v1721_v57 = vmul.f32 %v4053_v51, %v1713_v55  ;;  %4375 = vmatprep.mubr.msk.f32.mxu1 %vm70_vm0, %v1728_v56 }
 0xdbd   :  { %v1729_v58 = vadd.f32 %v4054_v53, %v1721_v57 }
 0xdbf   :  { %4376 = vmatmul.mubr.msk.f32.vlgmr.msra.gmra.mxu1 %vm70_vm0, %v1729_v58 }
 0xdc0   :  { %4398 = vmatpush3.msra.mxu1 %v4066_v38 }
 0xdc1   :  { %4399 = vmatprep.subr.mxu1 %v4065_v40 }
 0xdc2   :  { %4400 = vmatpush3.msra.mxu1 %v4065_v40 }
 0xdc3   :  { %4401 = vmatprep.subr.mxu1 %v4064_v41 }
 0xdc4   :  { %4402 = vmatpush3.msra.mxu1 %v4064_v41 }
 0xdc5   :  { %4403 = vmatprep.subr.mxu1 %v4063_v42 }
 0xdc6   :  { %4404 = vmatpush3.msra.mxu1 %v4063_v42  ;;  %v5198_v42 = vld [vmem:[%s5490_s29] ss:$0 sm:$0xff] }
 0xdc7   :  { %4408 = vmatprep.subr.mxu1 %v4686_v34 }
 0xe7f   :  { %v4377_v4 = vpop.f32.mrf.mxu1 }
 0xe80   :  { %v1819_v39 = vadd.f32 %v4377_v4, %v4055_v3 }
 0xe81   :  { %v1813_v5 = vpop.f32.mrf.mxu1 }
 0xe82   :  { %v1825_v6 = vmul.f32 0.70710677, %v1819_v39  ;;  %v1814_v7 = vadd.f32 %v4055_v3, %v1813_v5  ;;  %v1823_v14 = vmul.f32 0.5, %v1819_v39 }
 0xe84   :  { %4608 = verf.f32 %v1825_v6  ;;  %v1824_v8 = vmul.f32 0.70710677, %v1814_v7  ;;  %v1822_v12 = vmul.f32 0.5, %v1814_v7 }
 0xe86   :  { %4610 = verf.f32 %v1824_v8 }
 0xe91   :  { %v4609_v9 = vpop.eup %4608 }
 0xe92   :  { %v1829_v11 = vadd.f32 1.0, %v4609_v9 }
 0xe93   :  { %v4611_v10 = vpop.eup %4610 }
 0xe94   :  { %v1828_v13 = vadd.f32 1.0, %v4611_v10  ;;  %v1831_v16 = vmul.f32 %v1829_v11, %v1823_v14 }
 0xe96   :  { %v1830_v15 = vmul.f32 %v1828_v13, %v1822_v12 }
 0xe98   :  { %4394 = vmatprep.mubr.msk.f32.mxu0 %vm1847_vm6, %v1830_v15 }
 0xe99   :  { %4395 = vmatmul.mubr.msk.f32.vlgmr.msra.gmra.mxu0 %vm1847_vm6, %v1831_v16 }
 0xe9a   :  { %4420 = vmatprep.mubr.msk.f32.mxu0 %vm4687_vm1, %v4686_v34 }
 0xf59   :  { %v4396_v18 = vpop.f32.mrf.mxu0 }
 0xf5a   :  { %v1926_v19 = vadd.f32 %v4396_v18, %v4058_v17 }
 0xf5b   :  { %v1920_v20 = vpop.f32.mrf.mxu0 }
 0xf5c   :  { %v1921_v21 = vadd.f32 %v4058_v17, %v1920_v20  ;;  %v1930_v22 = vadd.f32 %v1926_v19, %v1729_v58 }
 0xf5e   :  { %v1936_v23 = vsel %vm70_vm0, %v1930_v22, 0.0  ;;  %v1929_v24 = vadd.f32 %v1921_v21, %v1728_v56  ;;  %v4062_v56 = vld [vmem:[%s5454_s15] ss:$0 sm:$0xff] }
 0xf5f   :  { %1937 = vadd.xlane.f32.xlu1 %v1936_v23 }
 0xf60   :  { %v1933_v25 = vsel %vm70_vm0, %v1929_v24, 0.0 }
 0xf61   :  { %1934 = vadd.xlane.f32.xlu0 %v1933_v25 }
 0xfe8   :  { %v1938_v26 = vpop.xlane.xlu1 %1937 }
 0xfe9   :  { %v1940_v27 = vmul.f32 0.03125, %v1938_v26 }
 0xfea   :  { %v1935_v28 = vpop.xlane.xlu0 %1934 }
 0xfeb   :  { %v1942_v29 = vsub.f32 %v1930_v22, %v1940_v27  ;;  %v1939_v30 = vmul.f32 0.03125, %v1935_v28 }
 0xfed   :  { %v1941_v32 = vsub.f32 %v1929_v24, %v1939_v30  ;;  %v1944_v35 = vmul.f32 %v1942_v29, %v1942_v29 }
 0xfef   :  { %v1948_v36 = vsel %vm70_vm0, %v1944_v35, 0.0  ;;  %v1943_v33 = vmul.f32 %v1941_v32, %v1941_v32 }
 0xff0   :  { %1949 = vadd.xlane.f32.xlu1 %v1948_v36 }
 0xff1   :  { %v1945_v31 = vsel %vm70_vm0, %v1943_v33, 0.0 }
 0xff2   :  { %1946 = vadd.xlane.f32.xlu0 %v1945_v31 }
0x1079   :  { %v1950_v44 = vpop.xlane.xlu1 %1949 }
0x107a   :  { %v1952_v45 = vmul.f32 0.03125, %v1950_v44 }
0x107b   :  { %v1947_v46 = vpop.xlane.xlu0 %1946 }
0x107c   :  { %v1954_v47 = vadd.f32 1e-12, %v1952_v45  ;;  %v1951_v49 = vmul.f32 0.03125, %v1947_v46 }
0x107e   :  { %4612 = vrsqrt.f32 %v1954_v47  ;;  %v1953_v50 = vadd.f32 1e-12, %v1951_v49 }
0x1080   :  { %4614 = vrsqrt.f32 %v1953_v50  ;;  %v5205_v50 = vld [vmem:[%s5490_s29 + $0x1] ss:$0 sm:$0xff]  ;;  %s5493_s29 = smov 48  }
0x108b   :  { %v4613_v51 = vpop.eup %4612 }
0x108c   :  { %v1958_v53 = vmul.f32 %v4613_v51, %v1942_v29 }
0x108d   :  { %v4615_v54 = vpop.eup %4614 }
0x108e   :  { %v1957_v37 = vmul.f32 %v4615_v54, %v1941_v32  ;;  %v1966_v55 = vmul.f32 %v4061_v52, %v1958_v53 }
0x1090   :  { %v1965_v57 = vmul.f32 %v4061_v52, %v1957_v37  ;;  %v5126_v59 = vadd.f32 %v4062_v56, %v1966_v55 }
0x1092   :  { %v5124_v58 = vadd.f32 %v4062_v56, %v1965_v57 }
0x1094   :  { %4405 = vmatprep.mubr.msk.f32.mxu1 %vm70_vm0, %v5124_v58 }
0x1095   :  { %4406 = vmatmul.mubr.msk.f32.vlgmr.msra.gmra.mxu1 %vm70_vm0, %v5126_v59 }
0x1096   :  { %4410 = vmatprep.mubr.msk.f32.mxu1 %vm4687_vm1, %v4686_v34 }
0x1155   :  { %v4407_v61 = vpop.f32.mrf.mxu1 }
0x1156   :  { %v5137_v62 = vadd.f32 %v4407_v61, %v4068_v60 }
0x1157   :  { %v2060_v63 = vpop.f32.mrf.mxu1 }
0x1158   :  { %v5139_v0 = vadd.f32 %v4068_v60, %v2060_v63  ;;  %2147 = vrot.lane.b32.xlu1 %v5137_v62, %s4688_s27 }
0x115a   :  { %2070 = vrot.lane.b32.xlu0 %v5139_v0, %s4688_s27 }
0x11ca   :  { %v2148_v2 = vpop.permute.xlu1 %2147 }
0x11cc   :  { %v2071_v1 = vpop.permute.xlu0 %2070 }
0x11cd   :  { %4409 = vmatpush3.xpose.msk.msra.mxu1 %vm223_vm2, %v2071_v1 }
0x11ce   :  { %4413 = vmatprep.subr.mxu1 %v4686_v34 }
0x11d0   :  { %4411 = vmatmul.mubr.msk.f32.vlgmr.msra.gmra.mxu1 %vm223_vm2, %v5139_v0 }
0x11d1   :  { %4414 = vmatpush3.xpose.msk.msra.mxu1 %vm223_vm2, %v2148_v2  ;;  %4415 = vmatprep.mubr.msk.f32.mxu1 %vm4687_vm1, %v4686_v34 }
0x11d2   :  { %4423 = vmatprep.subr.mxu1 %v4686_v34 }
0x11d4   :  { %4416 = vmatmul.mubr.msk.f32.vlgmr.msra.gmra.mxu1 %vm223_vm2, %v5137_v62 }
0x11d5   :  { %4425 = vmatprep.mubr.msk.f32.mxu1 %vm4687_vm1, %v4686_v34 }
0x1290   :  { %v2142_v3 = vpop.f32.mrf.mxu1 }
0x1291   :  { %v2223_v4 = vmul.f32 0.35355338, %v2142_v3 }
0x1292   :  { %v4412_v39 = vpop.f32.mrf.mxu1 }
0x1293   :  { %v2225_v5 = vadd.f32 %v4876_v43, %v2223_v4 }
0x1294   :  { %v2219_v6 = vpop.f32.mrf.mxu1 }
0x1295   :  { %v2224_v7 = vmul.f32 0.35355338, %v2219_v6  ;;  %v2227_v8 = vsel %vm223_vm2, %v2225_v5, -inf }
0x1296   :  { %2228 = vmax.xlane.f32.xlu1 %v2227_v8  ;;  %v4417_v9 = vpop.f32.mrf.mxu1 }
0x1297   :  { %v2226_v10 = vadd.f32 %v4882_v48, %v2224_v7 }
0x1299   :  { %v2230_v11 = vsel %vm223_vm2, %v2226_v10, -inf }
0x129a   :  { %2231 = vmax.xlane.f32.xlu0 %v2230_v11 }
0x12a7   :  { %2325 = vrot.lane.b32.xlu1 %v5137_v62, %s4689_s21 }
0x12ab   :  { %2405 = vrot.lane.b32.xlu1 %v5139_v0, %s4690_s1 }
0x12af   :  { %2483 = vrot.lane.b32.xlu1 %v5137_v62, %s4690_s1 }
0x131f   :  { %v2229_v43 = vpop.xlane.xlu1 %2228 }
0x1320   :  { %v2233_v12 = vsub.f32 %v2225_v5, %v2229_v43 }
0x1322   :  { %v2235_v13 = vmul.f32 1.442695, %v2233_v12 }
0x1323   :  { %v2326_v14 = vpop.permute.xlu1 %2325  ;;  %v2232_v15 = vpop.xlane.xlu0 %2231 }
0x1324   :  { %4616 = vpow2.f32 %v2235_v13  ;;  %v2234_v16 = vsub.f32 %v2226_v10, %v2232_v15  ;;  %4424 = vmatpush3.msra.mxu1 %v2326_v14 }
0x1325   :  { %4433 = vmatprep.subr.mxu1 %v4686_v34 }
0x1326   :  { %v2237_v48 = vmul.f32 1.442695, %v2234_v16 }
0x1327   :  { %v2406_v21 = vpop.permute.xlu1 %2405 }
0x1328   :  { %4618 = vpow2.f32 %v2237_v48 }
0x132b   :  { %v2484_v22 = vpop.permute.xlu1 %2483 }
0x1331   :  { %v4617_v17 = vpop.eup %4616 }
0x1332   :  { %v2239_v18 = vsel %vm223_vm2, %v4617_v17, 0.0 }
0x1333   :  { %2240 = vadd.xlane.f32.xlu0 %v2239_v18 }
0x1335   :  { %v4619_v19 = vpop.eup %4618 }
0x1336   :  { %v2242_v20 = vsel %vm223_vm2, %v4619_v19, 0.0 }
0x1337   :  { %2243 = vadd.xlane.f32.xlu1 %v2242_v20 }
0x1348   :  { %2481 = vrot.lane.b32.xlu1 %v5137_v62, %s4691_s22 }
0x1349   :  { %2249 = vrot.lane.b32.xlu0 %v5139_v0, %s4689_s21 }
0x134d   :  { %2403 = vrot.lane.b32.xlu0 %v5139_v0, %s4691_s22  ;;  %s5491_s22 = smov 80  }
0x13bc   :  { %v2241_v23 = vpop.xlane.xlu0 %2240 }
0x13bd   :  { %4620 = vrcp.f32 %v2241_v23 }
0x13c0   :  { %v2244_v24 = vpop.xlane.xlu1 %2243  ;;  %v2250_v25 = vpop.permute.xlu0 %2249 }
0x13c1   :  { %4622 = vrcp.f32 %v2244_v24  ;;  %4419 = vmatpush3.msra.mxu0 %v2250_v25 }
0x13c2   :  { %4428 = vmatprep.subr.mxu0 %v4686_v34 }
0x13c4   :  { %v2404_v30 = vpop.permute.xlu0 %2403  ;;  %v2482_v32 = vpop.permute.xlu1 %2481 }
0x13ca   :  { %v4621_v26 = vpop.eup %4620 }
0x13cb   :  { %v2246_v27 = vmul.f32 %v4621_v26, %v4617_v17 }
0x13cd   :  { %4421 = vmatmul.mubr.msk.f32.vlgmr.msra.gmra.mxu0 %vm223_vm2, %v2246_v27 }
0x13ce   :  { %v4623_v28 = vpop.eup %4622  ;;  %4429 = vmatpush3.xpose.msk.msra.mxu0 %vm223_vm2, %v2406_v21  ;;  %4430 = vmatprep.mubr.msk.f32.mxu0 %vm4687_vm1, %v4686_v34 }
0x13cf   :  { %v2248_v29 = vmul.f32 %v4623_v28, %v4619_v19  ;;  %4438 = vmatprep.subr.mxu0 %v4686_v34 }
0x13d1   :  { %4426 = vmatmul.mubr.msk.f32.vlgmr.msra.gmra.mxu1 %vm223_vm2, %v2248_v29  ;;  %4431 = vmatmul.mubr.msk.f32.vlgmr.msra.gmra.mxu0 %vm223_vm2, %v2404_v30 }
0x13d2   :  { %4434 = vmatpush3.xpose.msk.msra.mxu1 %vm223_vm2, %v2484_v22  ;;  %4435 = vmatprep.mubr.msk.f32.mxu1 %vm4687_vm1, %v4686_v34 }
0x13d3   :  { %4443 = vmatprep.subr.mxu1 %v4686_v34  ;;  %4440 = vmatprep.mubr.msk.f32.mxu0 %vm4687_vm1, %v4686_v34 }
0x13d5   :  { %4436 = vmatmul.mubr.msk.f32.vlgmr.msra.gmra.mxu1 %vm223_vm2, %v2482_v32 }
0x13d6   :  { %4445 = vmatprep.mubr.msk.f32.mxu1 %vm4687_vm1, %v4686_v34 }
0x148d   :  { %v2321_v35 = vpop.f32.mrf.mxu0 }
0x148e   :  { %2401 = vst.msk [vmem:[#allocation2] sm:$0xff] %vm223_vm2, %v2321_v35 }
0x148f   :  { %v4422_v36 = vpop.f32.mrf.mxu0 }
0x1491   :  { %v2397_v33 = vpop.f32.mrf.mxu1  ;;  %v2477_v31 = vpop.f32.mrf.mxu0 }
0x1492   :  { %2402 = vst.msk [vmem:[#allocation2 + $0x8] sm:$0xff] %vm223_vm2, %v2397_v33  ;;  %v2559_v38 = vmul.f32 0.35355338, %v2477_v31 }
0x1493   :  { %v4427_v40 = vpop.f32.mrf.mxu1  ;;  %v4432_v41 = vpop.f32.mrf.mxu0 }
0x1494   :  { %v2561_v44 = vadd.f32 %v5198_v42, %v2559_v38 }
0x1495   :  { %v2555_v45 = vpop.f32.mrf.mxu1 }
0x1496   :  { %v2560_v46 = vmul.f32 0.35355338, %v2555_v45  ;;  %v2563_v47 = vsel %vm223_vm2, %v2561_v44, -inf }
0x1497   :  { %2564 = vmax.xlane.f32.xlu0 %v2563_v47  ;;  %v4437_v49 = vpop.f32.mrf.mxu1 }
0x1498   :  { %v2562_v51 = vadd.f32 %v5205_v50, %v2560_v46 }
0x149a   :  { %v2566_v52 = vsel %vm223_vm2, %v2562_v51, -inf }
0x149b   :  { %2567 = vmax.xlane.f32.xlu1 %v2566_v52 }
0x14ac   :  { %2661 = vrot.lane.b32.xlu1 %v5137_v62, %s4692_s23 }
0x14ad   :  { %2585 = vrot.lane.b32.xlu0 %v5139_v0, %s4692_s23  ;;  %s5494_s23 = smov 72  }
0x14b0   :  { %2749 = vrot.lane.b32.xlu1 %v5139_v0, %s5491_s22 }
0x14b4   :  { %2827 = vrot.lane.b32.xlu1 %v5137_v62, %s5491_s22  ;;  %s5499_s22 = smov 24  }
0x14b8   :  { %2825 = vrot.lane.b32.xlu1 %v5137_v62, %s5492_s0 }
0x1520   :  { %v2565_v53 = vpop.xlane.xlu0 %2564 }
0x1521   :  { %v2569_v54 = vsub.f32 %v2561_v44, %v2565_v53 }
0x1523   :  { %v2571_v37 = vmul.f32 1.442695, %v2569_v54 }
0x1524   :  { %v2586_v55 = vpop.permute.xlu0 %2585  ;;  %v2568_v56 = vpop.xlane.xlu1 %2567 }
0x1525   :  { %4624 = vpow2.f32 %v2571_v37  ;;  %v2570_v57 = vsub.f32 %v2562_v51, %v2568_v56  ;;  %4439 = vmatpush3.msra.mxu0 %v2586_v55 }
0x1526   :  { %4448 = vmatprep.subr.mxu0 %v4686_v34 }
0x1527   :  { %v2573_v60 = vmul.f32 1.442695, %v2570_v57 }
0x1528   :  { %v2662_v61 = vpop.permute.xlu1 %2661 }
0x1529   :  { %4626 = vpow2.f32 %v2573_v60  ;;  %4444 = vmatpush3.msra.mxu1 %v2662_v61 }
0x152a   :  { %4453 = vmatprep.subr.mxu1 %v4686_v34 }
0x152c   :  { %v2750_v5 = vpop.permute.xlu1 %2749 }
0x1530   :  { %v2828_v9 = vpop.permute.xlu1 %2827 }
0x1532   :  { %v4625_v63 = vpop.eup %4624 }
0x1533   :  { %v2575_v1 = vsel %vm223_vm2, %v4625_v63, 0.0 }
0x1534   :  { %2576 = vadd.xlane.f32.xlu0 %v2575_v1  ;;  %v2826_v43 = vpop.permute.xlu1 %2825 }
0x1536   :  { %v4627_v2 = vpop.eup %4626 }
0x1537   :  { %v2578_v3 = vsel %vm223_vm2, %v4627_v2, 0.0 }
0x1538   :  { %2579 = vadd.xlane.f32.xlu0 %v2578_v3 }
0x154e   :  { %2747 = vrot.lane.b32.xlu0 %v5139_v0, %s5492_s0 }
0x15bd   :  { %v2577_v4 = vpop.xlane.xlu0 %2576 }
0x15be   :  { %4628 = vrcp.f32 %v2577_v4 }
0x15c1   :  { %v2580_v39 = vpop.xlane.xlu0 %2579 }
0x15c2   :  { %4630 = vrcp.f32 %v2580_v39 }
0x15c5   :  { %v2748_v11 = vpop.permute.xlu0 %2747 }
0x15cb   :  { %v4629_v6 = vpop.eup %4628 }
0x15cc   :  { %v2582_v7 = vmul.f32 %v4629_v6, %v4625_v63 }
0x15ce   :  { %4441 = vmatmul.mubr.msk.f32.vlgmr.msra.gmra.mxu0 %vm223_vm2, %v2582_v7 }
0x15cf   :  { %v4631_v8 = vpop.eup %4630  ;;  %4449 = vmatpush3.xpose.msk.msra.mxu0 %vm223_vm2, %v2750_v5  ;;  %4450 = vmatprep.mubr.msk.f32.mxu0 %vm4687_vm1, %v4686_v34 }
0x15d0   :  { %v2584_v10 = vmul.f32 %v4631_v8, %v4627_v2  ;;  %4458 = vmatprep.subr.mxu0 %v4686_v34 }
0x15d2   :  { %4446 = vmatmul.mubr.msk.f32.vlgmr.msra.gmra.mxu1 %vm223_vm2, %v2584_v10  ;;  %4451 = vmatmul.mubr.msk.f32.vlgmr.msra.gmra.mxu0 %vm223_vm2, %v2748_v11 }
0x15d3   :  { %4454 = vmatpush3.xpose.msk.msra.mxu1 %vm223_vm2, %v2828_v9  ;;  %4455 = vmatprep.mubr.msk.f32.mxu1 %vm4687_vm1, %v4686_v34 }
0x15d4   :  { %4463 = vmatprep.subr.mxu1 %v4686_v34  ;;  %4460 = vmatprep.mubr.msk.f32.mxu0 %vm4687_vm1, %v4686_v34 }
0x15d6   :  { %4456 = vmatmul.mubr.msk.f32.vlgmr.msra.gmra.mxu1 %vm223_vm2, %v2826_v43 }
0x15d7   :  { %4465 = vmatprep.mubr.msk.f32.mxu1 %vm4687_vm1, %v4686_v34 }
0x168e   :  { %v5241_v12 = vpop.f32.mrf.mxu0 }
0x1690   :  { %v4442_v13 = vpop.f32.mrf.mxu0 }
0x1692   :  { %v5243_v14 = vpop.f32.mrf.mxu1  ;;  %v2821_v15 = vpop.f32.mrf.mxu0 }
0x1693   :  { %v2903_v16 = vmul.f32 0.35355338, %v2821_v15 }
0x1694   :  { %v4447_v48 = vpop.f32.mrf.mxu1  ;;  %v4452_v17 = vpop.f32.mrf.mxu0 }
0x1695   :  { %v2905_v18 = vadd.f32 %v5198_v42, %v2903_v16 }
0x1696   :  { %v2899_v19 = vpop.f32.mrf.mxu1 }
0x1697   :  { %v2904_v20 = vmul.f32 0.35355338, %v2899_v19  ;;  %v2907_v21 = vsel %vm223_vm2, %v2905_v18, -inf }
0x1698   :  { %2908 = vmax.xlane.f32.xlu0 %v2907_v21  ;;  %v4457_v22 = vpop.f32.mrf.mxu1 }
0x1699   :  { %v2906_v23 = vadd.f32 %v5205_v50, %v2904_v20 }
0x169b   :  { %v2910_v24 = vsel %vm223_vm2, %v2906_v23, -inf }
0x169c   :  { %2911 = vmax.xlane.f32.xlu1 %v2910_v24  ;;  %v4096_v24 = vld [vmem:[%s5445_s6 + $0x28] sm:$0xff] }
0x16ad   :  { %3005 = vrot.lane.b32.xlu1 %v5137_v62, %s5493_s29 }
0x16ae   :  { %2929 = vrot.lane.b32.xlu0 %v5139_v0, %s5493_s29 }
0x16b1   :  { %3093 = vrot.lane.b32.xlu1 %v5139_v0, %s5494_s23 }
0x16b5   :  { %3171 = vrot.lane.b32.xlu1 %v5137_v62, %s5494_s23 }
0x16b9   :  { %3169 = vrot.lane.b32.xlu1 %v5137_v62, %s5495_s24 }
0x1721   :  { %v2909_v25 = vpop.xlane.xlu0 %2908 }
0x1722   :  { %v2913_v26 = vsub.f32 %v2905_v18, %v2909_v25  ;;  %v4095_v25 = vld [vmem:[%s5445_s6 + $0x20] sm:$0xff] }
0x1724   :  { %v2915_v27 = vmul.f32 1.442695, %v2913_v26 }
0x1725   :  { %v2930_v28 = vpop.permute.xlu0 %2929  ;;  %v2912_v29 = vpop.xlane.xlu1 %2911 }
0x1726   :  { %4632 = vpow2.f32 %v2915_v27  ;;  %v2914_v30 = vsub.f32 %v2906_v23, %v2912_v29  ;;  %4459 = vmatpush3.msra.mxu0 %v2930_v28  ;;  %v4097_v23 = vld [vmem:[%s5445_s6 + $0x30] sm:$0xff] }
0x1727   :  { %4468 = vmatprep.subr.mxu0 %v4686_v34 }
0x1728   :  { %v2917_v32 = vmul.f32 1.442695, %v2914_v30 }
0x1729   :  { %v3006_v35 = vpop.permute.xlu1 %3005 }
0x172a   :  { %4634 = vpow2.f32 %v2917_v32  ;;  %4464 = vmatpush3.msra.mxu1 %v3006_v35 }
0x172b   :  { %4473 = vmatprep.subr.mxu1 %v4686_v34 }
0x172d   :  { %v3094_v44 = vpop.permute.xlu1 %3093 }
0x1731   :  { %v3172_v49 = vpop.permute.xlu1 %3171 }
0x1733   :  { %v4633_v36 = vpop.eup %4632 }
0x1734   :  { %v2919_v33 = vsel %vm223_vm2, %v4633_v36, 0.0 }
0x1735   :  { %2920 = vadd.xlane.f32.xlu0 %v2919_v33  ;;  %v3170_v53 = vpop.permute.xlu1 %3169  ;;  %v4100_v33 = vld [vmem:[%s5446_s7 + $0x1] ss:$0 sm:$0xff] }
0x1737   :  { %v4635_v31 = vpop.eup %4634 }
0x1738   :  { %v2922_v38 = vsel %vm223_vm2, %v4635_v31, 0.0 }
0x1739   :  { %2923 = vadd.xlane.f32.xlu0 %v2922_v38 }
0x174f   :  { %3091 = vrot.lane.b32.xlu0 %v5139_v0, %s5495_s24 }
0x17be   :  { %v2921_v40 = vpop.xlane.xlu0 %2920 }
0x17bf   :  { %4636 = vrcp.f32 %v2921_v40 }
0x17c2   :  { %v2924_v41 = vpop.xlane.xlu0 %2923 }
0x17c3   :  { %4638 = vrcp.f32 %v2924_v41 }
0x17c6   :  { %v3092_v52 = vpop.permute.xlu0 %3091 }
0x17cc   :  { %v4637_v45 = vpop.eup %4636 }
0x17cd   :  { %v2926_v46 = vmul.f32 %v4637_v45, %v4633_v36 }
0x17cf   :  { %4461 = vmatmul.mubr.msk.f32.vlgmr.msra.gmra.mxu0 %vm223_vm2, %v2926_v46 }
0x17d0   :  { %v4639_v47 = vpop.eup %4638  ;;  %4469 = vmatpush3.xpose.msk.msra.mxu0 %vm223_vm2, %v3094_v44  ;;  %4470 = vmatprep.mubr.msk.f32.mxu0 %vm4687_vm1, %v4686_v34 }
0x17d1   :  { %v2928_v51 = vmul.f32 %v4639_v47, %v4635_v31  ;;  %4478 = vmatprep.subr.mxu0 %v4686_v34 }
0x17d3   :  { %4466 = vmatmul.mubr.msk.f32.vlgmr.msra.gmra.mxu1 %vm223_vm2, %v2928_v51  ;;  %4471 = vmatmul.mubr.msk.f32.vlgmr.msra.gmra.mxu0 %vm223_vm2, %v3092_v52 }
0x17d4   :  { %4474 = vmatpush3.xpose.msk.msra.mxu1 %vm223_vm2, %v3172_v49  ;;  %4475 = vmatprep.mubr.msk.f32.mxu1 %vm4687_vm1, %v4686_v34 }
0x17d5   :  { %4483 = vmatprep.subr.mxu1 %v4686_v34  ;;  %4480 = vmatprep.mubr.msk.f32.mxu0 %vm4687_vm1, %v4686_v34 }
0x17d7   :  { %4476 = vmatmul.mubr.msk.f32.vlgmr.msra.gmra.mxu1 %vm223_vm2, %v3170_v53 }
0x17d8   :  { %4485 = vmatprep.mubr.msk.f32.mxu1 %vm4687_vm1, %v4686_v34 }
0x188f   :  { %v3001_v54 = vpop.f32.mrf.mxu0 }
0x1891   :  { %v4462_v37 = vpop.f32.mrf.mxu0 }
0x1893   :  { %v3077_v55 = vpop.f32.mrf.mxu1  ;;  %v3165_v56 = vpop.f32.mrf.mxu0 }
0x1894   :  { %v3247_v57 = vmul.f32 0.35355338, %v3165_v56 }
0x1895   :  { %v4467_v60 = vpop.f32.mrf.mxu1  ;;  %v4472_v61 = vpop.f32.mrf.mxu0 }
0x1896   :  { %v3249_v63 = vadd.f32 %v5198_v42, %v3247_v57  ;;  %v4109_v60 = vld [vmem:[%s5449_s10 + $0x30] sm:$0xff]  ;;  %v4108_v61 = vld [vmem:[%s5449_s10 + $0x28] sm:$0xff] }
0x1897   :  { %v3243_v1 = vpop.f32.mrf.mxu1 }
0x1898   :  { %v3248_v2 = vmul.f32 0.35355338, %v3243_v1  ;;  %v3251_v3 = vsel %vm223_vm2, %v3249_v63, -inf }
0x1899   :  { %3252 = vmax.xlane.f32.xlu0 %v3251_v3  ;;  %v4477_v4 = vpop.f32.mrf.mxu1 }
0x189a   :  { %v3250_v39 = vadd.f32 %v5205_v50, %v3248_v2 }
0x189c   :  { %v3254_v5 = vsel %vm223_vm2, %v3250_v39, -inf }
0x189d   :  { %3255 = vmax.xlane.f32.xlu1 %v3254_v5 }
0x18ae   :  { %3349 = vrot.lane.b32.xlu1 %v5137_v62, %s5496_s2 }
0x18b2   :  { %2739 = vrot.lane.b32.xlu1 %v5241_v12, %s5497_s25 }
0x18b6   :  { %2741 = vrot.lane.b32.xlu1 %v5243_v14, %s5497_s25 }
0x18ba   :  { %3085 = vrot.lane.b32.xlu1 %v3077_v55, %s5498_s3 }
0x1922   :  { %v3253_v42 = vpop.xlane.xlu0 %3252 }
0x1923   :  { %v3257_v6 = vsub.f32 %v3249_v63, %v3253_v42  ;;  %v4107_v63 = vld [vmem:[%s5449_s10 + $0x20] sm:$0xff] }
0x1925   :  { %v3259_v7 = vmul.f32 1.442695, %v3257_v6  ;;  %v4105_v6 = vld [vmem:[%s5447_s8 + $0x1] ss:$0 sm:$0xff] }
0x1926   :  { %v3256_v8 = vpop.xlane.xlu1 %3255 }
0x1927   :  { %4640 = vpow2.f32 %v3259_v7  ;;  %v3258_v50 = vsub.f32 %v3250_v39, %v3256_v8  ;;  %v4106_v8 = vld [vmem:[%s5448_s9 + $0x1] ss:$0 sm:$0xff] }
0x1929   :  { %v3261_v9 = vmul.f32 1.442695, %v3258_v50 }
0x192a   :  { %v3350_v10 = vpop.permute.xlu1 %3349 }
0x192b   :  { %4642 = vpow2.f32 %v3261_v9  ;;  %4484 = vmatpush3.msra.mxu1 %v3350_v10 }
0x192e   :  { %v2740_v11 = vpop.permute.xlu1 %2739 }
0x192f   :  { %2745 = vst.msk [vmem:[#allocation2] sm:$0xff] %vm897_vm3, %v2740_v11 }
0x1932   :  { %v2742_v62 = vpop.permute.xlu1 %2741 }
0x1933   :  { %2746 = vst.msk [vmem:[#allocation2 + $0x8] sm:$0xff] %vm897_vm3, %v2742_v62 }
0x1934   :  { %v4641_v43 = vpop.eup %4640 }
0x1935   :  { %v3263_v12 = vsel %vm223_vm2, %v4641_v43, 0.0 }
0x1936   :  { %3264 = vadd.xlane.f32.xlu0 %v3263_v12  ;;  %v3086_v13 = vpop.permute.xlu1 %3085  ;;  %v4122_v12 = vld [vmem:[%s5451_s12 + $0x78] sm:$0xff] }
0x1937   :  { %3090 = vst.msk [vmem:[#allocation2 + $0x8] sm:$0xff] %vm1242_vm4, %v3086_v13  ;;  %v4121_v13 = vld [vmem:[%s5451_s12 + $0x70] sm:$0xff] }
0x1938   :  { %v4643_v14 = vpop.eup %4642 }
0x1939   :  { %v3266_v15 = vsel %vm223_vm2, %v4643_v14, 0.0 }
0x193a   :  { %3267 = vadd.xlane.f32.xlu0 %v3266_v15  ;;  %v4119_v15 = vld [vmem:[%s5451_s12 + $0x60] sm:$0xff] }
0x1950   :  { %3273 = vrot.lane.b32.xlu0 %v5139_v0, %s5496_s2  ;;  %v4098_v0 = vld [vmem:[%s5445_s6 + $0x38] sm:$0xff] }
0x1954   :  { %3083 = vrot.lane.b32.xlu0 %v3001_v54, %s5498_s3 }
0x19bf   :  { %v3265_v16 = vpop.xlane.xlu0 %3264 }
0x19c0   :  { %4644 = vrcp.f32 %v3265_v16  ;;  %v4118_v16 = vld [vmem:[%s5451_s12 + $0x58] sm:$0xff] }
0x19c3   :  { %v3268_v48 = vpop.xlane.xlu0 %3267 }
0x19c4   :  { %4646 = vrcp.f32 %v3268_v48  ;;  %v4117_v48 = vld [vmem:[%s5451_s12 + $0x50] sm:$0xff] }
0x19c7   :  { %v3274_v17 = vpop.permute.xlu0 %3273 }
0x19c8   :  { %4479 = vmatpush3.msra.mxu0 %v3274_v17  ;;  %v4116_v17 = vld [vmem:[%s5451_s12 + $0x48] sm:$0xff] }
0x19c9   :  { %4488 = vmatprep.subr.mxu0 %v4098_v0 }
0x19cb   :  { %v3084_v18 = vpop.permute.xlu0 %3083 }
0x19cc   :  { %3089 = vst.msk [vmem:[#allocation2] sm:$0xff] %vm1242_vm4, %v3084_v18  ;;  %v4115_v18 = vld [vmem:[%s5451_s12 + $0x40] sm:$0xff] }
0x19cd   :  { %v4645_v19 = vpop.eup %4644 }
0x19ce   :  { %v3270_v20 = vmul.f32 %v4645_v19, %v4641_v43  ;;  %v4112_v19 = vld [vmem:[%s5450_s11 + $0x1] ss:$0 sm:$0xff] }
0x19d0   :  { %4481 = vmatmul.mubr.msk.f32.vlgmr.msra.gmra.mxu0 %vm223_vm2, %v3270_v20 }
0x19d1   :  { %v4647_v21 = vpop.eup %4646  ;;  %4489 = vmatpush3.msra.mxu0 %v4098_v0 }
0x19d2   :  { %v3272_v22 = vmul.f32 %v4647_v21, %v4643_v14  ;;  %4490 = vmatprep.subr.mxu0 %v4097_v23  ;;  %v4120_v14 = vld [vmem:[%s5451_s12 + $0x68] sm:$0xff] }
0x19d3   :  { %4491 = vmatpush3.msra.mxu0 %v4097_v23 }
0x19d4   :  { %4486 = vmatmul.mubr.msk.f32.vlgmr.msra.gmra.mxu1 %vm223_vm2, %v3272_v22  ;;  %4492 = vmatprep.subr.mxu0 %v4096_v24 }
0x19d5   :  { %4493 = vmatpush3.msra.mxu0 %v4096_v24 }
0x19d6   :  { %4494 = vmatprep.subr.mxu0 %v4095_v25 }
0x19d7   :  { %4495 = vmatpush3.msra.mxu0 %v4095_v25 }
0x19d8   :  { %4510 = vmatprep.subr.mxu0 %v4122_v12 }
0x1a90   :  { %v3345_v26 = vpop.f32.mrf.mxu0 }
0x1a91   :  { %3427 = vrot.lane.b32.xlu0 %v3345_v26, %s5499_s22 }
0x1a92   :  { %v4482_v27 = vpop.f32.mrf.mxu0 }
0x1a94   :  { %v3421_v28 = vpop.f32.mrf.mxu1 }
0x1a95   :  { %3429 = vrot.lane.b32.xlu1 %v3421_v28, %s5499_s22 }
0x1a96   :  { %v4487_v29 = vpop.f32.mrf.mxu1 }
0x1b03   :  { %v3428_v30 = vpop.permute.xlu0 %3427 }
0x1b04   :  { %3433 = vst.msk [vmem:[#allocation2] sm:$0xff] %vm1587_vm5, %v3428_v30 }
0x1b07   :  { %v3430_v32 = vpop.permute.xlu1 %3429 }
0x1b08   :  { %3434 = vst.msk [vmem:[#allocation2 + $0x8] sm:$0xff] %vm1587_vm5, %v3430_v32 }
0x1b0b   :  { %v3435_v35 = vld [vmem:[#allocation2] sm:$0xff] }
0x1b0c   :  { %4496 = vmatprep.mubr.msk.f32.mxu0 %vm70_vm0, %v3435_v35 }
0x1b0f   :  { %v3436_v36 = vld [vmem:[#allocation2 + $0x8] sm:$0xff] }
0x1b10   :  { %4497 = vmatmul.mubr.msk.f32.vlgmr.msra.gmra.mxu0 %vm70_vm0, %v3436_v36  ;;  %v4124_v36 = vld [vmem:[%s5452_s13 + $0x1] ss:$0 sm:$0xff] }
0x1b11   :  { %4511 = vmatpush3.msra.mxu0 %v4122_v12 }
0x1b12   :  { %4512 = vmatprep.subr.mxu0 %v4121_v13 }
0x1b13   :  { %4513 = vmatpush3.msra.mxu0 %v4121_v13  ;;  %v3922_v13 = vld [vmem:[%s5457_s18 + $0x18] sm:$0xff] }
0x1b14   :  { %4514 = vmatprep.subr.mxu0 %v4120_v14 }
0x1b15   :  { %4515 = vmatpush3.msra.mxu0 %v4120_v14  ;;  %v3921_v14 = vld [vmem:[%s5457_s18 + $0x10] sm:$0xff] }
0x1b16   :  { %4516 = vmatprep.subr.mxu0 %v4119_v15 }
0x1b17   :  { %4517 = vmatpush3.msra.mxu0 %v4119_v15  ;;  %v3920_v15 = vld [vmem:[%s5457_s18 + $0x8] sm:$0xff] }
0x1b18   :  { %4518 = vmatprep.subr.mxu0 %v4118_v16 }
0x1b19   :  { %4519 = vmatpush3.msra.mxu0 %v4118_v16  ;;  %v3919_v16 = vld [vmem:[%s5457_s18] sm:$0xff]  ;;  %s4702_s18 = smov [#allocation3]  }
0x1b1a   :  { %4520 = vmatprep.subr.mxu0 %v4117_v48  ;;  %s4011_s28 = sshll.u32 %s4702_s18, 4  ;;  %s4012_s28 = int_to_ptr.vmem [resolvable:$true] %s4011_s28 }
0x1b1b   :  { %4521 = vmatpush3.msra.mxu0 %v4117_v48  ;;  %v4131_v48 = vld [vmem:[%s5456_s17] ss:$0 sm:$0xff]  ;;  %s4664_s17 = scalar_lea.vmem %s4012_s28, 32  ;;  %p4669_p1 = scmp.lt.s32.totalorder %s4012_s28, %s4012_s28 }
0x1b1c   :  { %4522 = vmatprep.subr.mxu0 %v4116_v17  ;;  %p4665_p0 = scmp.ne.s32.totalorder %s4012_s28, %s4664_s17  ;;  %p4670_p2 = scmp.lt.s32.totalorder %s4664_s17, %s4664_s17 }
0x1b1d   :  { %4523 = vmatpush3.msra.mxu0 %v4116_v17 }
0x1b1e   :  { %4524 = vmatprep.subr.mxu0 %v4115_v18  ;;  %p4671_p3 = por %p4670_p2, %p4669_p1 }
0x1b1f   :  { %4525 = vmatpush3.msra.mxu0 %v4115_v18 }
0x1b20   :  { %p4672_p4 = pnand %p4671_p3, %p4665_p0 }
0x1bd0   :  { %v4498_v31 = vpop.f32.mrf.mxu0 }
0x1bd1   :  { %v3528_v38 = vadd.f32 %v4498_v31, %v4100_v33 }
0x1bd2   :  { %v3522_v40 = vpop.f32.mrf.mxu0 }
0x1bd3   :  { %v3532_v41 = vadd.f32 %v3528_v38, %v5126_v59  ;;  %v3523_v44 = vadd.f32 %v4100_v33, %v3522_v40 }
0x1bd5   :  { %v3531_v45 = vadd.f32 %v3523_v44, %v5124_v58  ;;  %v3540_v46 = vsel %vm70_vm0, %v3532_v41, 0.0  ;;  %v4110_v58 = vld [vmem:[%s5449_s10 + $0x38] sm:$0xff] }
0x1bd6   :  { %3541 = vadd.xlane.f32.xlu1 %v3540_v46  ;;  %4499 = vmatprep.subr.mxu1 %v4110_v58 }
0x1bd7   :  { %v3537_v47 = vsel %vm70_vm0, %v3531_v45, 0.0  ;;  %4500 = vmatpush3.msra.mxu1 %v4110_v58  ;;  %v3836_v58 = vld [vmem:[%s5455_s16 + $0x10] sm:$0xff] }
0x1bd8   :  { %3538 = vadd.xlane.f32.xlu0 %v3537_v47  ;;  %4501 = vmatprep.subr.mxu1 %v4109_v60 }
0x1bd9   :  { %4502 = vmatpush3.msra.mxu1 %v4109_v60  ;;  %v3835_v60 = vld [vmem:[%s5455_s16 + $0x8] sm:$0xff] }
0x1bda   :  { %4503 = vmatprep.subr.mxu1 %v4108_v61 }
0x1bdb   :  { %4504 = vmatpush3.msra.mxu1 %v4108_v61  ;;  %v3834_v61 = vld [vmem:[%s5455_s16] sm:$0xff] }
0x1bdc   :  { %4505 = vmatprep.subr.mxu1 %v4107_v63 }
0x1bdd   :  { %4506 = vmatpush3.msra.mxu1 %v4107_v63 }
0x1bde   :  { %4529 = vmatprep.subr.mxu1 %v4686_v34 }
0x1c5f   :  { %v3542_v49 = vpop.xlane.xlu1 %3541 }
0x1c60   :  { %v3544_v51 = vmul.f32 0.03125, %v3542_v49 }
0x1c61   :  { %v3539_v52 = vpop.xlane.xlu0 %3538 }
0x1c62   :  { %v3543_v53 = vmul.f32 0.03125, %v3539_v52  ;;  %v3546_v54 = vsub.f32 %v3532_v41, %v3544_v51 }
0x1c64   :  { %v3545_v37 = vsub.f32 %v3531_v45, %v3543_v53  ;;  %v3548_v57 = vmul.f32 %v3546_v54, %v3546_v54 }
0x1c66   :  { %v3547_v55 = vmul.f32 %v3545_v37, %v3545_v37  ;;  %v3552_v59 = vsel %vm70_vm0, %v3548_v57, 0.0 }
0x1c68   :  { %v3549_v56 = vsel %vm70_vm0, %v3547_v55, 0.0 }
0x1c69   :  { %3550 = vadd.xlane.f32.xlu0 %v3549_v56 }
0x1c6d   :  { %3553 = vadd.xlane.f32.xlu0 %v3552_v59  ;;  %v3837_v59 = vld [vmem:[%s5455_s16 + $0x18] sm:$0xff] }
0x1cf2   :  { %v3551_v1 = vpop.xlane.xlu0 %3550 }
0x1cf3   :  { %v3555_v2 = vmul.f32 0.03125, %v3551_v1 }
0x1cf5   :  { %v3557_v3 = vadd.f32 1e-12, %v3555_v2 }
0x1cf6   :  { %v3554_v4 = vpop.xlane.xlu0 %3553 }
0x1cf7   :  { %4648 = vrsqrt.f32 %v3557_v3  ;;  %v3556_v39 = vmul.f32 0.03125, %v3554_v4 }
0x1cf9   :  { %v3558_v5 = vadd.f32 1e-12, %v3556_v39 }
0x1cfb   :  { %4650 = vrsqrt.f32 %v3558_v5 }
0x1d04   :  { %v4649_v42 = vpop.eup %4648 }
0x1d05   :  { %v3561_v7 = vmul.f32 %v4649_v42, %v3545_v37  ;;  %v4129_v42 = vld [vmem:[%s5453_s14 + $0x1] ss:$0 sm:$0xff] }
0x1d07   :  { %v3569_v50 = vmul.f32 %v4105_v6, %v3561_v7 }
0x1d08   :  { %v4651_v9 = vpop.eup %4650 }
0x1d09   :  { %v3562_v10 = vmul.f32 %v4651_v9, %v3546_v54  ;;  %v3577_v11 = vadd.f32 %v4106_v8, %v3569_v50 }
0x1d0b   :  { %v3570_v62 = vmul.f32 %v4105_v6, %v3562_v10  ;;  %4507 = vmatprep.mubr.msk.f32.mxu1 %vm70_vm0, %v3577_v11 }
0x1d0d   :  { %v3578_v43 = vadd.f32 %v4106_v8, %v3570_v62  ;;  %v4130_v8 = vld [vmem:[%s5454_s15 + $0x1] ss:$0 sm:$0xff] }
0x1d0f   :  { %4508 = vmatmul.mubr.msk.f32.vlgmr.msra.gmra.mxu1 %vm70_vm0, %v3578_v43 }
0x1d10   :  { %4537 = vmatprep.mubr.msk.f32.mxu1 %vm4687_vm1, %v4686_v34  ;;  %4530 = vmatpush3.msra.mxu1 %v3837_v59 }
0x1d11   :  { %4531 = vmatprep.subr.mxu1 %v4686_v34 }
0x1d12   :  { %4532 = vmatpush3.msra.mxu1 %v3836_v58 }
0x1d13   :  { %4533 = vmatprep.subr.mxu1 %v4686_v34 }
0x1d14   :  { %4534 = vmatpush3.msra.mxu1 %v3835_v60 }
0x1d15   :  { %4535 = vmatprep.subr.mxu1 %v4686_v34 }
0x1d16   :  { %4536 = vmatpush3.msra.mxu1 %v3834_v61 }
0x1d17   :  { %4540 = vmatprep.subr.mxu1 %v4686_v34 }
0x1dcf   :  { %v4509_v20 = vpop.f32.mrf.mxu1 }
0x1dd0   :  { %v3670_v21 = vadd.f32 %v4509_v20, %v4112_v19 }
0x1dd1   :  { %v3664_v22 = vpop.f32.mrf.mxu1 }
0x1dd2   :  { %v3676_v0 = vmul.f32 0.70710677, %v3670_v21  ;;  %v3665_v23 = vadd.f32 %v4112_v19, %v3664_v22  ;;  %v3674_v30 = vmul.f32 0.5, %v3670_v21  ;;  %v4133_v21 = vld [vmem:[%s5458_s19] ss:$0 sm:$0xff] }
0x1dd4   :  { %4652 = verf.f32 %v3676_v0  ;;  %v3675_v24 = vmul.f32 0.70710677, %v3665_v23  ;;  %v3673_v28 = vmul.f32 0.5, %v3665_v23 }
0x1dd6   :  { %4654 = verf.f32 %v3675_v24 }
0x1de1   :  { %v4653_v25 = vpop.eup %4652 }
0x1de2   :  { %v3680_v27 = vadd.f32 1.0, %v4653_v25 }
0x1de3   :  { %v4655_v26 = vpop.eup %4654 }
0x1de4   :  { %v3679_v29 = vadd.f32 1.0, %v4655_v26  ;;  %v3682_v35 = vmul.f32 %v3680_v27, %v3674_v30 }
0x1de6   :  { %v3681_v32 = vmul.f32 %v3679_v29, %v3673_v28 }
0x1de8   :  { %4526 = vmatprep.mubr.msk.f32.mxu0 %vm1847_vm6, %v3681_v32 }
0x1de9   :  { %4527 = vmatmul.mubr.msk.f32.vlgmr.msra.gmra.mxu0 %vm1847_vm6, %v3682_v35 }
0x1ea9   :  { %v4528_v33 = vpop.f32.mrf.mxu0 }
0x1eaa   :  { %v3778_v31 = vadd.f32 %v4528_v33, %v4124_v36 }
0x1eab   :  { %v3772_v38 = vpop.f32.mrf.mxu0 }
0x1eac   :  { %v3782_v40 = vadd.f32 %v3778_v31, %v3578_v43  ;;  %v3773_v41 = vadd.f32 %v4124_v36, %v3772_v38 }
0x1eae   :  { %v3781_v44 = vadd.f32 %v3773_v41, %v3577_v11  ;;  %v3790_v45 = vsel %vm70_vm0, %v3782_v40, 0.0 }
0x1eaf   :  { %3791 = vadd.xlane.f32.xlu0 %v3790_v45 }
0x1eb0   :  { %v3787_v46 = vsel %vm70_vm0, %v3781_v44, 0.0 }
0x1eb1   :  { %3788 = vadd.xlane.f32.xlu1 %v3787_v46 }
0x1f38   :  { %v3792_v47 = vpop.xlane.xlu0 %3791 }
0x1f39   :  { %v3794_v49 = vmul.f32 0.03125, %v3792_v47 }
0x1f3a   :  { %v3789_v51 = vpop.xlane.xlu1 %3788 }
0x1f3b   :  { %v3796_v52 = vsub.f32 %v3782_v40, %v3794_v49  ;;  %v3793_v53 = vmul.f32 0.03125, %v3789_v51 }
0x1f3d   :  { %v3795_v54 = vsub.f32 %v3781_v44, %v3793_v53  ;;  %v3798_v37 = vmul.f32 %v3796_v52, %v3796_v52 }
0x1f3f   :  { %v3802_v55 = vsel %vm70_vm0, %v3798_v37, 0.0  ;;  %v3797_v56 = vmul.f32 %v3795_v54, %v3795_v54 }
0x1f40   :  { %3803 = vadd.xlane.f32.xlu0 %v3802_v55 }
0x1f41   :  { %v3799_v57 = vsel %vm70_vm0, %v3797_v56, 0.0 }
0x1f42   :  { %3800 = vadd.xlane.f32.xlu1 %v3799_v57 }
0x1fc9   :  { %v3804_v63 = vpop.xlane.xlu0 %3803 }
0x1fca   :  { %v3806_v1 = vmul.f32 0.03125, %v3804_v63 }
0x1fcb   :  { %v3801_v2 = vpop.xlane.xlu1 %3800 }
0x1fcc   :  { %v3808_v3 = vadd.f32 1e-12, %v3806_v1  ;;  %v3805_v4 = vmul.f32 0.03125, %v3801_v2 }
0x1fce   :  { %4656 = vrsqrt.f32 %v3808_v3  ;;  %v3807_v39 = vadd.f32 1e-12, %v3805_v4 }
0x1fd0   :  { %4658 = vrsqrt.f32 %v3807_v39 }
0x1fdb   :  { %v4657_v5 = vpop.eup %4656 }
0x1fdc   :  { %v3812_v6 = vmul.f32 %v4657_v5, %v3796_v52 }
0x1fdd   :  { %v4659_v7 = vpop.eup %4658 }
0x1fde   :  { %v3811_v50 = vmul.f32 %v4659_v7, %v3795_v54  ;;  %v3820_v9 = vmul.f32 %v4129_v42, %v3812_v6 }
0x1fe0   :  { %v3819_v10 = vmul.f32 %v4129_v42, %v3811_v50  ;;  %v3828_v11 = vadd.f32 %v4130_v8, %v3820_v9 }
0x1fe2   :  { %v3827_v62 = vadd.f32 %v4130_v8, %v3819_v10  ;;  %v3830_v43 = vrot.slane %v3828_v11, 7 }
0x1fe4   :  { %v3833_v12 = vsel %vm3832_vm7, %v3827_v62, %v3830_v43 }
0x1fe5   :  { %4538 = vmatmul.mubr.msk.f32.vlgmr.msra.gmra.mxu1 %vm70_vm0, %v3833_v12 }
0x1fe6   :  { %4548 = vmatprep.mubr.msk.f32.mxu1 %vm4687_vm1, %v4686_v34  ;;  %4541 = vmatpush3.msra.mxu1 %v3922_v13 }
0x1fe7   :  { %4542 = vmatprep.subr.mxu1 %v4686_v34 }
0x1fe8   :  { %4543 = vmatpush3.msra.mxu1 %v3921_v14 }
0x1fe9   :  { %4544 = vmatprep.subr.mxu1 %v4686_v34 }
0x1fea   :  { %4545 = vmatpush3.msra.mxu1 %v3920_v15 }
0x1feb   :  { %4546 = vmatprep.subr.mxu1 %v4686_v34 }
0x1fec   :  { %4547 = vmatpush3.msra.mxu1 %v3919_v16 }
0x20a5   :  { %v3914_v17 = vpop.f32.mrf.mxu1 }
0x20a6   :  { %v3915_v18 = vadd.f32 %v4131_v48, %v3914_v17 }
0x20a7   :  { %v4539_v19 = vpop.f32.mrf.mxu1 }
0x20a8   :  { %4660 = vtanh.f32 %v3915_v18 }
0x20b5   :  { %v4661_v20 = vpop.eup %4660 }
0x20b6   :  { %4549 = vmatmul.mubr.msk.f32.vlgmr.msra.gmra.mxu1 %vm70_vm0, %v4661_v20 }
0x2176   :  { %v3999_v22 = vpop.f32.mrf.mxu1 }
0x2177   :  { %v4000_v34 = vadd.f32 %v4133_v21, %v3999_v22 }
0x2178   :  { %v4550_v0 = vpop.f32.mrf.mxu1 }
0x2179   :  { %4004 = vst.msk [vmem:[#allocation3] sm:$0x3] %vm4003_vm8, %v4000_v34 }
0x217a   :  { %4675 = shalt.err (!%p4672_p4)
}
0x217b   :  { %4014 = dma.vmem_to_hbm [thread:$0]  %s4012_s28, 32, %s5459_s20, [#allocation4]  }
0x217c   :  { %4684 = dma.done.wait [#allocation4], 32  }
0x217d   :  { %4685 = vsyncadd [#allocation4], 4294967264 }
0x217e   :  { %4018 = vsyncpa [#allocation4], 1 }

</bundles_post_ra>
